<compile_context>
chip_gen: v7x
topology: tpu7x:2x2x1
jax: 0.10.0
libtpu: 0.0.40
codegen_flags: <defaults>
</compile_context>

<pallas_src>
import functools
import math

import jax
import jax.numpy as jnp
from jax import lax
from jax.experimental import pallas as pl
from jax.experimental.pallas import tpu as pltpu


def _largest_divisor_at_most(n, cap):
    cap = max(1, min(n, cap))
    for cand in range(cap, 0, -1):
        if n % cand == 0:
            return cand
    return 1


def _self_attention_kernel(q_ref, k_ref, v_ref,
                           wq_ref, bq_ref, wk_ref, bk_ref,
                           wv_ref, bv_ref, wf_ref, bf_ref,
                           x_ref, attn_ref, acc_ref,
                           *, heads_per_group, head_dim):
    g = pl.program_id(2)

    q = q_ref[0]            # (tq, H) bf16
    k = k_ref[0]            # (S,  H) bf16
    v = v_ref[0]

    # Weight arrays are VMEM-resident for the whole grid (constant index_map);
    # select this head-group's slab with a VMEM-side dynamic index.
    wq = wq_ref[g]          # (H, G*d) bf16
    wk = wk_ref[g]
    wv = wv_ref[g]
    wf = wf_ref[g]          # (G*d, H) bf16

    # Wide-N projections: (tq|S, H) @ (H, G*d); 1/sqrt(d) pre-folded into wq/bq.
    # Cast to bf16 right after the bias add to halve the live footprint.
    Qf = (jnp.dot(q, wq, preferred_element_type=jnp.float32) + bq_ref[g]).astype(jnp.bfloat16)
    Kf = (jnp.dot(k, wk, preferred_element_type=jnp.float32) + bk_ref[g]).astype(jnp.bfloat16)
    Vf = (jnp.dot(v, wv, preferred_element_type=jnp.float32) + bv_ref[g]).astype(jnp.bfloat16)

    d = head_dim
    ctx_cols = []
    for h in range(heads_per_group):          # static unroll over heads in the group (G <= 8)
        lo = h * d
        Qh = Qf[:, lo:lo + d]                 # (tq, d) bf16
        Kh = Kf[:, lo:lo + d]                 # (S,  d) bf16
        Vh = Vf[:, lo:lo + d]

        # energy = Qh @ Kh.T without materializing a transpose (contract last dims).
        energy = lax.dot_general(Qh, Kh, (((1,), (1,)), ((), ())),
                                 preferred_element_type=jnp.float32)   # (tq, S) f32

        # TODO(synk): mask==0 -> -1e10 fill omitted (mask=None path reproduced).
        m = jnp.max(energy, axis=-1, keepdims=True)
        e = jnp.exp(energy - m)                                        # f32 (v5e-safe)
        attn = e * pl.reciprocal(jnp.sum(e, axis=-1, keepdims=True), approx=False)
        # Dropout: eval mode => identity.  TODO(synk): training-mode dropout not implemented.
        attn_ref[0, h] = attn.astype(attn_ref.dtype)

        ctx_cols.append(jnp.dot(attn.astype(jnp.bfloat16), Vh,
                                preferred_element_type=jnp.float32))   # (tq, d) f32

    # (tq, G*d) context -> output projection with contraction depth K = G*d,
    # accumulated over head groups in the f32 VMEM scratch.
    ctx = jnp.concatenate(ctx_cols, axis=-1).astype(jnp.bfloat16)

    @pl.when(g == 0)
    def _():
        acc_ref[...] = jnp.zeros_like(acc_ref)

    acc_ref[...] += jnp.dot(ctx, wf, preferred_element_type=jnp.float32)

    @pl.when(g == pl.num_programs(2) - 1)
    def _():
        x_ref[0] = (acc_ref[...] + bf_ref[...]).astype(x_ref.dtype)


def self_attention_pallas(query, key, value, params, n_heads, *,
                          attn_dtype=jnp.bfloat16, mask=None):
    if mask is not None:
        raise NotImplementedError("TODO(synk): mask != None path not implemented.")

    B, S, H = query.shape
    assert H % n_heads == 0
    d = H // n_heads

    # Head-group batching: G heads per grid step so projection N = G*d ~ MXU width.
    G = _largest_divisor_at_most(n_heads, min(max(1, 256 // d), 8))
    n_groups = n_heads // G
    Gd = G * d

    # Query tiling: bounds per-step VMEM (v7x 64 MiB) and adds a parallel axis.
    tq = S
    for cand in (512, 256, 128):
        if S > cand and S % cand == 0:
            tq = cand
            break
    n_qt = S // tq

    wq, bq, wk, bk, wv, bv, wf, bf = params
    inv_scale = 1.0 / math.sqrt(float(d))

    # PyTorch nn.Linear: y = x @ W.T + b.  Pre-transpose and pack per head-group
    # so the kernel sees MXU-ready operands (no in-kernel transposes).
    def in_proj(w, b, s=1.0):
        wg = (w.T * s).reshape(H, n_groups, Gd).transpose(1, 0, 2)    # (ng, H, G*d)
        bg = (b * s).reshape(n_groups, 1, Gd)                          # (ng, 1, G*d)
        return wg.astype(jnp.bfloat16), bg.astype(jnp.float32)

    wq_g, bq_g = in_proj(wq, bq, inv_scale)   # fold 1/sqrt(d) into the Q projection
    wk_g, bk_g = in_proj(wk, bk)
    wv_g, bv_g = in_proj(wv, bv)
    wf_g = wf.T.reshape(n_groups, Gd, H).astype(jnp.bfloat16)          # (ng, G*d, H)
    bf_2 = bf.reshape(1, H).astype(jnp.float32)

    q_bf = query.astype(jnp.bfloat16)
    k_bf = key.astype(jnp.bfloat16)
    v_bf = value.astype(jnp.bfloat16)

    q_spec  = pl.BlockSpec((1, tq, H), lambda b, t, g: (b, t, 0))
    kv_spec = pl.BlockSpec((1, S, H),  lambda b, t, g: (b, 0, 0))
    # Whole-array weight blocks with constant index_maps -> single HBM fetch,
    # resident in VMEM for the entire grid.
    w_in_spec  = pl.BlockSpec((n_groups, H, Gd), lambda b, t, g: (0, 0, 0))
    b_in_spec  = pl.BlockSpec((n_groups, 1, Gd), lambda b, t, g: (0, 0, 0))
    w_out_spec = pl.BlockSpec((n_groups, Gd, H), lambda b, t, g: (0, 0, 0))
    b_out_spec = pl.BlockSpec((1, H), lambda b, t, g: (0, 0))

    x_spec    = pl.BlockSpec((1, tq, H), lambda b, t, g: (b, t, 0))
    attn_spec = pl.BlockSpec((1, G, tq, S), lambda b, t, g: (b, g, t, 0))

    grid_spec = pltpu.PrefetchScalarGridSpec(
        num_scalar_prefetch=0,
        grid=(B, n_qt, n_groups),
        in_specs=[q_spec, kv_spec, kv_spec,
                  w_in_spec, b_in_spec, w_in_spec, b_in_spec,
                  w_in_spec, b_in_spec, w_out_spec, b_out_spec],
        out_specs=[x_spec, attn_spec],
        scratch_shapes=[pltpu.VMEM((tq, H), jnp.float32)],
    )

    out_shape = (jax.ShapeDtypeStruct((B, S, H), jnp.float32),
                 jax.ShapeDtypeStruct((B, n_heads, S, S), attn_dtype))

    # Scheduler hints + scoped-VMEM limit sized from the actual resident blocks
    # and the device's VMEM capacity (generation-aware instead of a 48 MiB cap).
    attn_bytes = jnp.dtype(attn_dtype).itemsize
    flops = int(B * (2 * S * H * H                      # Q projection
                     + 2 * 2 * S * H * H * n_qt         # K,V projections (per q-tile)
                     + 4 * S * S * H                    # QK^T + PV over all heads
                     + 2 * S * H * H))                  # output projection
    transc = int(B * n_heads * S * S)
    bytes_acc = int((1 + 2 * n_qt) * B * S * H * 2      # q once, k/v per q-tile
                    + 4 * H * H * 2 + 4 * H * 4         # weights + biases (once)
                    + B * S * H * 4                     # x out (f32)
                    + B * n_heads * S * S * attn_bytes)

    resident = int(2 * ((tq + 2 * S) * H * 2                          # q,k,v (double-buffered)
                        + tq * H * 4 + G * tq * S * attn_bytes)       # output blocks
                   + 2 * (4 * H * H * 2 + (3 * n_groups * Gd + H) * 4)  # weights/biases
                   + tq * H * 4)                                      # acc scratch
    try:
        vmem_cap = int(pltpu.get_tpu_info().vmem_capacity_bytes)
    except Exception:
        vmem_cap = 128 << 20
    upper = min(100 << 20, vmem_cap * 4 // 5)
    vmem_limit = int(max(min(resident + (4 << 20), upper), 32 << 20))

    kernel = functools.partial(_self_attention_kernel,
                               heads_per_group=G, head_dim=d)

    return pl.pallas_call(
        kernel,
        grid_spec=grid_spec,
        out_shape=out_shape,
        compiler_params=pltpu.CompilerParams(
            dimension_semantics=("parallel", "parallel", "arbitrary"),
            vmem_limit_bytes=vmem_limit),
        cost_estimate=pl.CostEstimate(flops=flops, transcendentals=transc,
                                      bytes_accessed=bytes_acc),
    )(q_bf, k_bf, v_bf,
      wq_g, bq_g, wk_g, bk_g, wv_g, bv_g, wf_g, bf_2)


def self_attention_ref(query, key, value, params, n_heads):
    """Pure-JAX f32 reference replicating the PyTorch forward (eval, mask=None)."""
    wq, bq, wk, bk, wv, bv, wf, bf = params
    B, S, H = query.shape
    d = H // n_heads
    scale = math.sqrt(float(d))

    Q = query @ wq.T + bq
    K = key @ wk.T + bk
    V = value @ wv.T + bv
    Q = Q.reshape(B, S, n_heads, d).transpose(0, 2, 1, 3)
    K = K.reshape(B, S, n_heads, d).transpose(0, 2, 1, 3)
    V = V.reshape(B, S, n_heads, d).transpose(0, 2, 1, 3)
    energy = jnp.einsum("bhqd,bhkd->bhqk", Q, K) / scale
    attention = jax.nn.softmax(energy, axis=-1)
    x = jnp.einsum("bhqk,bhkd->bhqd", attention, V)
    x = x.transpose(0, 2, 1, 3).reshape(B, S, H)
    x = x @ wf.T + bf
    return x, attention


if __name__ == "__main__":
    B, S, H, NH = 2, 8, 32, 4
    key0 = jax.random.PRNGKey(0)
    ks = jax.random.split(key0, 16)

    # Deterministic "Linear" parameters (PyTorch shape convention: W is [out, in]).
    bound = 1.0 / math.sqrt(H)
    def lin(kw, kb):
        w = jax.random.uniform(kw, (H, H), jnp.float32, -bound, bound)
        b = jax.random.uniform(kb, (H,), jnp.float32, -bound, bound)
        return w, b

    wq, bq = lin(ks[0], ks[1])
    wk, bk = lin(ks[2], ks[3])
    wv, bv = lin(ks[4], ks[5])
    wf, bf = lin(ks[6], ks[7])
    params = (wq, bq, wk, bk, wv, bv, wf, bf)

    query = jax.random.normal(ks[8], (B, S, H), jnp.float32)
    key_in = jax.random.normal(ks[9], (B, S, H), jnp.float32)
    value = jax.random.normal(ks[10], (B, S, H), jnp.float32)

    x_out, attn_out = self_attention_pallas(query, key_in, value, params, NH)
    jax.block_until_ready((x_out, attn_out))

    x_ref, attn_ref = self_attention_ref(query, key_in, value, params, NH)
    attn_out_f32 = attn_out.astype(jnp.float32)
    # bf16 MXU inputs + bf16 attention output => relaxed tolerances vs f32 reference.
    assert jnp.allclose(x_out, x_ref, atol=3e-2, rtol=3e-2), (
        float(jnp.max(jnp.abs(x_out - x_ref))))
    assert jnp.allclose(attn_out_f32, attn_ref, atol=3e-2, rtol=3e-2), (
        float(jnp.max(jnp.abs(attn_out_f32 - attn_ref))))

    print("KERNEL_OK")
</pallas_src>

<mosaic_0001>
module attributes {stable_mosaic.version = 11 : i64} {
  func.func @_self_attention_kernel(%arg0: i32, %arg1: i32, %arg2: i32, %arg3: memref<1x8x32xbf16, #tpu.memory_space<vmem>>, %arg4: memref<1x8x32xbf16, #tpu.memory_space<vmem>>, %arg5: memref<1x8x32xbf16, #tpu.memory_space<vmem>>, %arg6: memref<1x32x32xbf16, #tpu.memory_space<vmem>>, %arg7: memref<1x1x32xf32, #tpu.memory_space<vmem>>, %arg8: memref<1x32x32xbf16, #tpu.memory_space<vmem>>, %arg9: memref<1x1x32xf32, #tpu.memory_space<vmem>>, %arg10: memref<1x32x32xbf16, #tpu.memory_space<vmem>>, %arg11: memref<1x1x32xf32, #tpu.memory_space<vmem>>, %arg12: memref<1x32x32xbf16, #tpu.memory_space<vmem>>, %arg13: memref<1x32xf32, #tpu.memory_space<vmem>>, %arg14: memref<1x8x32xf32, #tpu.memory_space<vmem>>, %arg15: memref<1x4x8x8xbf16, #tpu.memory_space<vmem>>, %arg16: memref<8x32xf32, #tpu.memory_space<vmem>>) attributes {dimension_semantics = [#tpu.dimension_semantics<parallel>, #tpu.dimension_semantics<parallel>, #tpu.dimension_semantics<arbitrary>], iteration_bounds = array<i64: 2, 1, 1>, scalar_prefetch = 0 : i64, scratch_operands = 1 : i64, tpu.core_type = #tpu.core_type<tc>, window_params = [{transform_indices = @transform_0, window_bounds = array<i64: 1, 8, 32>}, {transform_indices = @transform_1, window_bounds = array<i64: 1, 8, 32>}, {transform_indices = @transform_2, window_bounds = array<i64: 1, 8, 32>}, {pipeline_mode = #tpu.pipeline_mode<synchronous>, transform_indices = @transform_3, window_bounds = array<i64: 1, 32, 32>}, {pipeline_mode = #tpu.pipeline_mode<synchronous>, transform_indices = @transform_4, window_bounds = array<i64: 1, 1, 32>}, {pipeline_mode = #tpu.pipeline_mode<synchronous>, transform_indices = @transform_5, window_bounds = array<i64: 1, 32, 32>}, {pipeline_mode = #tpu.pipeline_mode<synchronous>, transform_indices = @transform_6, window_bounds = array<i64: 1, 1, 32>}, {pipeline_mode = #tpu.pipeline_mode<synchronous>, transform_indices = @transform_7, window_bounds = array<i64: 1, 32, 32>}, {pipeline_mode = #tpu.pipeline_mode<synchronous>, transform_indices = @transform_8, window_bounds = array<i64: 1, 1, 32>}, {pipeline_mode = #tpu.pipeline_mode<synchronous>, transform_indices = @transform_9, window_bounds = array<i64: 1, 32, 32>}, {pipeline_mode = #tpu.pipeline_mode<synchronous>, transform_indices = @transform_10, window_bounds = array<i64: 1, 32>}, {transform_indices = @transform_11, window_bounds = array<i64: 1, 8, 32>}, {transform_indices = @transform_12, window_bounds = array<i64: 1, 4, 8, 8>}]} {
    %c0 = arith.constant 0 : index
    %c0_0 = arith.constant 0 : index
    %c0_1 = arith.constant 0 : index
    %0 = vector.load %arg3[%c0, %c0_0, %c0_1] : memref<1x8x32xbf16, #tpu.memory_space<vmem>>, vector<1x8x32xbf16>
    %1 = vector.shape_cast %0 : vector<1x8x32xbf16> to vector<8x32xbf16>
    %c0_2 = arith.constant 0 : index
    %c0_3 = arith.constant 0 : index
    %c0_4 = arith.constant 0 : index
    %2 = vector.load %arg4[%c0_2, %c0_3, %c0_4] : memref<1x8x32xbf16, #tpu.memory_space<vmem>>, vector<1x8x32xbf16>
    %3 = vector.shape_cast %2 : vector<1x8x32xbf16> to vector<8x32xbf16>
    %c0_5 = arith.constant 0 : index
    %c0_6 = arith.constant 0 : index
    %c0_7 = arith.constant 0 : index
    %4 = vector.load %arg5[%c0_5, %c0_6, %c0_7] : memref<1x8x32xbf16, #tpu.memory_space<vmem>>, vector<1x8x32xbf16>
    %5 = vector.shape_cast %4 : vector<1x8x32xbf16> to vector<8x32xbf16>
    %6 = arith.index_cast %arg2 : i32 to index
    %c0_8 = arith.constant 0 : index
    %c0_9 = arith.constant 0 : index
    %7 = vector.load %arg6[%6, %c0_8, %c0_9] : memref<1x32x32xbf16, #tpu.memory_space<vmem>>, vector<1x32x32xbf16>
    %8 = vector.shape_cast %7 : vector<1x32x32xbf16> to vector<32x32xbf16>
    %9 = arith.index_cast %arg2 : i32 to index
    %c0_10 = arith.constant 0 : index
    %c0_11 = arith.constant 0 : index
    %10 = vector.load %arg8[%9, %c0_10, %c0_11] : memref<1x32x32xbf16, #tpu.memory_space<vmem>>, vector<1x32x32xbf16>
    %11 = vector.shape_cast %10 : vector<1x32x32xbf16> to vector<32x32xbf16>
    %12 = arith.index_cast %arg2 : i32 to index
    %c0_12 = arith.constant 0 : index
    %c0_13 = arith.constant 0 : index
    %13 = vector.load %arg10[%12, %c0_12, %c0_13] : memref<1x32x32xbf16, #tpu.memory_space<vmem>>, vector<1x32x32xbf16>
    %14 = vector.shape_cast %13 : vector<1x32x32xbf16> to vector<32x32xbf16>
    %15 = arith.index_cast %arg2 : i32 to index
    %c0_14 = arith.constant 0 : index
    %c0_15 = arith.constant 0 : index
    %16 = vector.load %arg12[%15, %c0_14, %c0_15] : memref<1x32x32xbf16, #tpu.memory_space<vmem>>, vector<1x32x32xbf16>
    %17 = vector.shape_cast %16 : vector<1x32x32xbf16> to vector<32x32xbf16>
    %cst = arith.constant dense<0.000000e+00> : vector<8x32xf32>
    %18 = tpu.matmul %1, %8, %cst {dimension_numbers = #tpu.dot_dimension_numbers<[1], [0], [0], [1], [0, 0, 1, 1], [], []>} : vector<8x32xbf16>, vector<32x32xbf16>, vector<8x32xf32> -> vector<8x32xf32>
    %19 = arith.index_cast %arg2 : i32 to index
    %c0_16 = arith.constant 0 : index
    %c0_17 = arith.constant 0 : index
    %20 = vector.load %arg7[%19, %c0_16, %c0_17] : memref<1x1x32xf32, #tpu.memory_space<vmem>>, vector<1x1x32xf32>
    %21 = vector.shape_cast %20 : vector<1x1x32xf32> to vector<1x32xf32>
    %22 = vector.broadcast %21 : vector<1x32xf32> to vector<8x32xf32>
    %23 = arith.addf %18, %22 : vector<8x32xf32>
    %24 = arith.truncf %23 : vector<8x32xf32> to vector<8x32xbf16>
    %cst_18 = arith.constant dense<0.000000e+00> : vector<8x32xf32>
    %25 = tpu.matmul %3, %11, %cst_18 {dimension_numbers = #tpu.dot_dimension_numbers<[1], [0], [0], [1], [0, 0, 1, 1], [], []>} : vector<8x32xbf16>, vector<32x32xbf16>, vector<8x32xf32> -> vector<8x32xf32>
    %26 = arith.index_cast %arg2 : i32 to index
    %c0_19 = arith.constant 0 : index
    %c0_20 = arith.constant 0 : index
    %27 = vector.load %arg9[%26, %c0_19, %c0_20] : memref<1x1x32xf32, #tpu.memory_space<vmem>>, vector<1x1x32xf32>
    %28 = vector.shape_cast %27 : vector<1x1x32xf32> to vector<1x32xf32>
    %29 = vector.broadcast %28 : vector<1x32xf32> to vector<8x32xf32>
    %30 = arith.addf %25, %29 : vector<8x32xf32>
    %31 = arith.truncf %30 : vector<8x32xf32> to vector<8x32xbf16>
    %cst_21 = arith.constant dense<0.000000e+00> : vector<8x32xf32>
    %32 = tpu.matmul %5, %14, %cst_21 {dimension_numbers = #tpu.dot_dimension_numbers<[1], [0], [0], [1], [0, 0, 1, 1], [], []>} : vector<8x32xbf16>, vector<32x32xbf16>, vector<8x32xf32> -> vector<8x32xf32>
    %33 = arith.index_cast %arg2 : i32 to index
    %c0_22 = arith.constant 0 : index
    %c0_23 = arith.constant 0 : index
    %34 = vector.load %arg11[%33, %c0_22, %c0_23] : memref<1x1x32xf32, #tpu.memory_space<vmem>>, vector<1x1x32xf32>
    %35 = vector.shape_cast %34 : vector<1x1x32xf32> to vector<1x32xf32>
    %36 = vector.broadcast %35 : vector<1x32xf32> to vector<8x32xf32>
    %37 = arith.addf %32, %36 : vector<8x32xf32>
    %38 = arith.truncf %37 : vector<8x32xf32> to vector<8x32xbf16>
    %39 = vector.extract_strided_slice %24 {offsets = [0, 0], sizes = [8, 8], strides = [1, 1]} : vector<8x32xbf16> to vector<8x8xbf16>
    %40 = vector.extract_strided_slice %31 {offsets = [0, 0], sizes = [8, 8], strides = [1, 1]} : vector<8x32xbf16> to vector<8x8xbf16>
    %41 = vector.extract_strided_slice %38 {offsets = [0, 0], sizes = [8, 8], strides = [1, 1]} : vector<8x32xbf16> to vector<8x8xbf16>
    %cst_24 = arith.constant dense<0.000000e+00> : vector<8x8xf32>
    %42 = tpu.matmul %39, %40, %cst_24 {dimension_numbers = #tpu.dot_dimension_numbers<[1], [1], [0], [0], [0, 0, 1, 0], [], []>} : vector<8x8xbf16>, vector<8x8xbf16>, vector<8x8xf32> -> vector<8x8xf32>
    %cst_25 = arith.constant dense<0xFF800000> : vector<8xf32>
    %43 = vector.multi_reduction <maximumf>, %42, %cst_25 [1] : vector<8x8xf32> to vector<8xf32>
    %44 = vector.shape_cast %43 : vector<8xf32> to vector<8x1xf32>
    %45 = vector.broadcast %44 : vector<8x1xf32> to vector<8x8xf32>
    %46 = arith.subf %42, %45 : vector<8x8xf32>
    %47 = math.exp %46 : vector<8x8xf32>
    %cst_26 = arith.constant dense<0.000000e+00> : vector<8xf32>
    %48 = vector.multi_reduction <add>, %47, %cst_26 [1] : vector<8x8xf32> to vector<8xf32>
    %49 = vector.shape_cast %48 : vector<8xf32> to vector<8x1xf32>
    %50 = tpu.reciprocal %49 : vector<8x1xf32> -> vector<8x1xf32>
    %51 = vector.broadcast %50 : vector<8x1xf32> to vector<8x8xf32>
    %52 = arith.mulf %47, %51 : vector<8x8xf32>
    %53 = arith.truncf %52 : vector<8x8xf32> to vector<8x8xbf16>
    %c0_27 = arith.constant 0 : index
    %c0_28 = arith.constant 0 : index
    %c0_29 = arith.constant 0 : index
    %c0_30 = arith.constant 0 : index
    %54 = vector.load %arg15[%c0_27, %c0_28, %c0_29, %c0_30] : memref<1x4x8x8xbf16, #tpu.memory_space<vmem>>, vector<1x1x8x8xbf16>
    %55 = vector.shape_cast %54 : vector<1x1x8x8xbf16> to vector<8x8xbf16>
    %56 = vector.shape_cast %53 : vector<8x8xbf16> to vector<1x1x8x8xbf16>
    tpu.vector_store %arg15[%c0_27, %c0_28, %c0_29, %c0_30], %56 {strides = array<i32>} : memref<1x4x8x8xbf16, #tpu.memory_space<vmem>>, vector<1x1x8x8xbf16>,
    %57 = arith.truncf %52 : vector<8x8xf32> to vector<8x8xbf16>
    %cst_31 = arith.constant dense<0.000000e+00> : vector<8x8xf32>
    %58 = tpu.matmul %57, %41, %cst_31 {dimension_numbers = #tpu.dot_dimension_numbers<[1], [0], [0], [1], [0, 0, 1, 1], [], []>} : vector<8x8xbf16>, vector<8x8xbf16>, vector<8x8xf32> -> vector<8x8xf32>
    %59 = vector.extract_strided_slice %24 {offsets = [0, 8], sizes = [8, 8], strides = [1, 1]} : vector<8x32xbf16> to vector<8x8xbf16>
    %60 = vector.extract_strided_slice %31 {offsets = [0, 8], sizes = [8, 8], strides = [1, 1]} : vector<8x32xbf16> to vector<8x8xbf16>
    %61 = vector.extract_strided_slice %38 {offsets = [0, 8], sizes = [8, 8], strides = [1, 1]} : vector<8x32xbf16> to vector<8x8xbf16>
    %cst_32 = arith.constant dense<0.000000e+00> : vector<8x8xf32>
    %62 = tpu.matmul %59, %60, %cst_32 {dimension_numbers = #tpu.dot_dimension_numbers<[1], [1], [0], [0], [0, 0, 1, 0], [], []>} : vector<8x8xbf16>, vector<8x8xbf16>, vector<8x8xf32> -> vector<8x8xf32>
    %cst_33 = arith.constant dense<0xFF800000> : vector<8xf32>
    %63 = vector.multi_reduction <maximumf>, %62, %cst_33 [1] : vector<8x8xf32> to vector<8xf32>
    %64 = vector.shape_cast %63 : vector<8xf32> to vector<8x1xf32>
    %65 = vector.broadcast %64 : vector<8x1xf32> to vector<8x8xf32>
    %66 = arith.subf %62, %65 : vector<8x8xf32>
    %67 = math.exp %66 : vector<8x8xf32>
    %cst_34 = arith.constant dense<0.000000e+00> : vector<8xf32>
    %68 = vector.multi_reduction <add>, %67, %cst_34 [1] : vector<8x8xf32> to vector<8xf32>
    %69 = vector.shape_cast %68 : vector<8xf32> to vector<8x1xf32>
    %70 = tpu.reciprocal %69 : vector<8x1xf32> -> vector<8x1xf32>
    %71 = vector.broadcast %70 : vector<8x1xf32> to vector<8x8xf32>
    %72 = arith.mulf %67, %71 : vector<8x8xf32>
    %73 = arith.truncf %72 : vector<8x8xf32> to vector<8x8xbf16>
    %c0_35 = arith.constant 0 : index
    %c1 = arith.constant 1 : index
    %c0_36 = arith.constant 0 : index
    %c0_37 = arith.constant 0 : index
    %74 = vector.load %arg15[%c0_35, %c1, %c0_36, %c0_37] : memref<1x4x8x8xbf16, #tpu.memory_space<vmem>>, vector<1x1x8x8xbf16>
    %75 = vector.shape_cast %74 : vector<1x1x8x8xbf16> to vector<8x8xbf16>
    %76 = vector.shape_cast %73 : vector<8x8xbf16> to vector<1x1x8x8xbf16>
    tpu.vector_store %arg15[%c0_35, %c1, %c0_36, %c0_37], %76 {strides = array<i32>} : memref<1x4x8x8xbf16, #tpu.memory_space<vmem>>, vector<1x1x8x8xbf16>,
    %77 = arith.truncf %72 : vector<8x8xf32> to vector<8x8xbf16>
    %cst_38 = arith.constant dense<0.000000e+00> : vector<8x8xf32>
    %78 = tpu.matmul %77, %61, %cst_38 {dimension_numbers = #tpu.dot_dimension_numbers<[1], [0], [0], [1], [0, 0, 1, 1], [], []>} : vector<8x8xbf16>, vector<8x8xbf16>, vector<8x8xf32> -> vector<8x8xf32>
    %79 = vector.extract_strided_slice %24 {offsets = [0, 16], sizes = [8, 8], strides = [1, 1]} : vector<8x32xbf16> to vector<8x8xbf16>
    %80 = vector.extract_strided_slice %31 {offsets = [0, 16], sizes = [8, 8], strides = [1, 1]} : vector<8x32xbf16> to vector<8x8xbf16>
    %81 = vector.extract_strided_slice %38 {offsets = [0, 16], sizes = [8, 8], strides = [1, 1]} : vector<8x32xbf16> to vector<8x8xbf16>
    %cst_39 = arith.constant dense<0.000000e+00> : vector<8x8xf32>
    %82 = tpu.matmul %79, %80, %cst_39 {dimension_numbers = #tpu.dot_dimension_numbers<[1], [1], [0], [0], [0, 0, 1, 0], [], []>} : vector<8x8xbf16>, vector<8x8xbf16>, vector<8x8xf32> -> vector<8x8xf32>
    %cst_40 = arith.constant dense<0xFF800000> : vector<8xf32>
    %83 = vector.multi_reduction <maximumf>, %82, %cst_40 [1] : vector<8x8xf32> to vector<8xf32>
    %84 = vector.shape_cast %83 : vector<8xf32> to vector<8x1xf32>
    %85 = vector.broadcast %84 : vector<8x1xf32> to vector<8x8xf32>
    %86 = arith.subf %82, %85 : vector<8x8xf32>
    %87 = math.exp %86 : vector<8x8xf32>
    %cst_41 = arith.constant dense<0.000000e+00> : vector<8xf32>
    %88 = vector.multi_reduction <add>, %87, %cst_41 [1] : vector<8x8xf32> to vector<8xf32>
    %89 = vector.shape_cast %88 : vector<8xf32> to vector<8x1xf32>
    %90 = tpu.reciprocal %89 : vector<8x1xf32> -> vector<8x1xf32>
    %91 = vector.broadcast %90 : vector<8x1xf32> to vector<8x8xf32>
    %92 = arith.mulf %87, %91 : vector<8x8xf32>
    %93 = arith.truncf %92 : vector<8x8xf32> to vector<8x8xbf16>
    %c0_42 = arith.constant 0 : index
    %c2 = arith.constant 2 : index
    %c0_43 = arith.constant 0 : index
    %c0_44 = arith.constant 0 : index
    %94 = vector.load %arg15[%c0_42, %c2, %c0_43, %c0_44] : memref<1x4x8x8xbf16, #tpu.memory_space<vmem>>, vector<1x1x8x8xbf16>
    %95 = vector.shape_cast %94 : vector<1x1x8x8xbf16> to vector<8x8xbf16>
    %96 = vector.shape_cast %93 : vector<8x8xbf16> to vector<1x1x8x8xbf16>
    tpu.vector_store %arg15[%c0_42, %c2, %c0_43, %c0_44], %96 {strides = array<i32>} : memref<1x4x8x8xbf16, #tpu.memory_space<vmem>>, vector<1x1x8x8xbf16>,
    %97 = arith.truncf %92 : vector<8x8xf32> to vector<8x8xbf16>
    %cst_45 = arith.constant dense<0.000000e+00> : vector<8x8xf32>
    %98 = tpu.matmul %97, %81, %cst_45 {dimension_numbers = #tpu.dot_dimension_numbers<[1], [0], [0], [1], [0, 0, 1, 1], [], []>} : vector<8x8xbf16>, vector<8x8xbf16>, vector<8x8xf32> -> vector<8x8xf32>
    %99 = vector.extract_strided_slice %24 {offsets = [0, 24], sizes = [8, 8], strides = [1, 1]} : vector<8x32xbf16> to vector<8x8xbf16>
    %100 = vector.extract_strided_slice %31 {offsets = [0, 24], sizes = [8, 8], strides = [1, 1]} : vector<8x32xbf16> to vector<8x8xbf16>
    %101 = vector.extract_strided_slice %38 {offsets = [0, 24], sizes = [8, 8], strides = [1, 1]} : vector<8x32xbf16> to vector<8x8xbf16>
    %cst_46 = arith.constant dense<0.000000e+00> : vector<8x8xf32>
    %102 = tpu.matmul %99, %100, %cst_46 {dimension_numbers = #tpu.dot_dimension_numbers<[1], [1], [0], [0], [0, 0, 1, 0], [], []>} : vector<8x8xbf16>, vector<8x8xbf16>, vector<8x8xf32> -> vector<8x8xf32>
    %cst_47 = arith.constant dense<0xFF800000> : vector<8xf32>
    %103 = vector.multi_reduction <maximumf>, %102, %cst_47 [1] : vector<8x8xf32> to vector<8xf32>
    %104 = vector.shape_cast %103 : vector<8xf32> to vector<8x1xf32>
    %105 = vector.broadcast %104 : vector<8x1xf32> to vector<8x8xf32>
    %106 = arith.subf %102, %105 : vector<8x8xf32>
    %107 = math.exp %106 : vector<8x8xf32>
    %cst_48 = arith.constant dense<0.000000e+00> : vector<8xf32>
    %108 = vector.multi_reduction <add>, %107, %cst_48 [1] : vector<8x8xf32> to vector<8xf32>
    %109 = vector.shape_cast %108 : vector<8xf32> to vector<8x1xf32>
    %110 = tpu.reciprocal %109 : vector<8x1xf32> -> vector<8x1xf32>
    %111 = vector.broadcast %110 : vector<8x1xf32> to vector<8x8xf32>
    %112 = arith.mulf %107, %111 : vector<8x8xf32>
    %113 = arith.truncf %112 : vector<8x8xf32> to vector<8x8xbf16>
    %c0_49 = arith.constant 0 : index
    %c3 = arith.constant 3 : index
    %c0_50 = arith.constant 0 : index
    %c0_51 = arith.constant 0 : index
    %114 = vector.load %arg15[%c0_49, %c3, %c0_50, %c0_51] : memref<1x4x8x8xbf16, #tpu.memory_space<vmem>>, vector<1x1x8x8xbf16>
    %115 = vector.shape_cast %114 : vector<1x1x8x8xbf16> to vector<8x8xbf16>
    %116 = vector.shape_cast %113 : vector<8x8xbf16> to vector<1x1x8x8xbf16>
    tpu.vector_store %arg15[%c0_49, %c3, %c0_50, %c0_51], %116 {strides = array<i32>} : memref<1x4x8x8xbf16, #tpu.memory_space<vmem>>, vector<1x1x8x8xbf16>,
    %117 = arith.truncf %112 : vector<8x8xf32> to vector<8x8xbf16>
    %cst_52 = arith.constant dense<0.000000e+00> : vector<8x8xf32>
    %118 = tpu.matmul %117, %101, %cst_52 {dimension_numbers = #tpu.dot_dimension_numbers<[1], [0], [0], [1], [0, 0, 1, 1], [], []>} : vector<8x8xbf16>, vector<8x8xbf16>, vector<8x8xf32> -> vector<8x8xf32>
    %119 = tpu.concatenate %58, %78, %98, %118 in 1 : vector<8x8xf32>, vector<8x8xf32>, vector<8x8xf32>, vector<8x8xf32> -> vector<8x32xf32>
    %120 = arith.truncf %119 : vector<8x32xf32> to vector<8x32xbf16>
    %c0_i32 = arith.constant 0 : i32
    %121 = arith.cmpi eq, %arg2, %c0_i32 : i32
    %122 = arith.extui %121 : i1 to i32
    %c0_i32_53 = arith.constant 0 : i32
    %123 = arith.cmpi ne, %122, %c0_i32_53 : i32
    scf.if %123 {
      %cst_61 = arith.constant 0.000000e+00 : f32
      %131 = vector.broadcast %cst_61 : f32 to vector<8x32xf32>
      %c0_62 = arith.constant 0 : index
      %c0_63 = arith.constant 0 : index
      %132 = vector.load %arg16[%c0_62, %c0_63] : memref<8x32xf32, #tpu.memory_space<vmem>>, vector<8x32xf32>
      tpu.vector_store %arg16[%c0_62, %c0_63], %131 {strides = array<i32>} : memref<8x32xf32, #tpu.memory_space<vmem>>, vector<8x32xf32>,
    } else {
    }
    %c0_54 = arith.constant 0 : index
    %c0_55 = arith.constant 0 : index
    %124 = vector.load %arg16[%c0_54, %c0_55] : memref<8x32xf32, #tpu.memory_space<vmem>>, vector<8x32xf32>
    %cst_56 = arith.constant dense<0.000000e+00> : vector<8x32xf32>
    %125 = tpu.matmul %120, %17, %cst_56 {dimension_numbers = #tpu.dot_dimension_numbers<[1], [0], [0], [1], [0, 0, 1, 1], [], []>} : vector<8x32xbf16>, vector<32x32xbf16>, vector<8x32xf32> -> vector<8x32xf32>
    %126 = arith.addf %124, %125 : vector<8x32xf32>
    %c0_57 = arith.constant 0 : index
    %c0_58 = arith.constant 0 : index
    %127 = vector.load %arg16[%c0_57, %c0_58] : memref<8x32xf32, #tpu.memory_space<vmem>>, vector<8x32xf32>
    tpu.vector_store %arg16[%c0_57, %c0_58], %126 {strides = array<i32>} : memref<8x32xf32, #tpu.memory_space<vmem>>, vector<8x32xf32>,
    %c0_i32_59 = arith.constant 0 : i32
    %128 = arith.cmpi eq, %arg2, %c0_i32_59 : i32
    %129 = arith.extui %128 : i1 to i32
    %c0_i32_60 = arith.constant 0 : i32
    %130 = arith.cmpi ne, %129, %c0_i32_60 : i32
    scf.if %130 {
      %c0_61 = arith.constant 0 : index
      %c0_62 = arith.constant 0 : index
      %131 = vector.load %arg16[%c0_61, %c0_62] : memref<8x32xf32, #tpu.memory_space<vmem>>, vector<8x32xf32>
      %c0_63 = arith.constant 0 : index
      %c0_64 = arith.constant 0 : index
      %132 = vector.load %arg13[%c0_63, %c0_64] : memref<1x32xf32, #tpu.memory_space<vmem>>, vector<1x32xf32>
      %133 = vector.broadcast %132 : vector<1x32xf32> to vector<8x32xf32>
      %134 = arith.addf %131, %133 : vector<8x32xf32>
      %c0_65 = arith.constant 0 : index
      %c0_66 = arith.constant 0 : index
      %c0_67 = arith.constant 0 : index
      %135 = vector.load %arg14[%c0_65, %c0_66, %c0_67] : memref<1x8x32xf32, #tpu.memory_space<vmem>>, vector<1x8x32xf32>
      %136 = vector.shape_cast %135 : vector<1x8x32xf32> to vector<8x32xf32>
      %137 = vector.shape_cast %134 : vector<8x32xf32> to vector<1x8x32xf32>
      tpu.vector_store %arg14[%c0_65, %c0_66, %c0_67], %137 {strides = array<i32>} : memref<1x8x32xf32, #tpu.memory_space<vmem>>, vector<1x8x32xf32>,
    } else {
    }
    return
  }
  func.func @transform_0(%arg0: i32, %arg1: i32, %arg2: i32) -> (i32, i32, i32) {
    %c0_i32 = arith.constant 0 : i32
    %c0_i32_0 = arith.constant 0 : i32
    return %arg0, %arg1, %c0_i32 : i32, i32, i32
  }
  func.func @transform_1(%arg0: i32, %arg1: i32, %arg2: i32) -> (i32, i32, i32) {
    %c0_i32 = arith.constant 0 : i32
    %c0_i32_0 = arith.constant 0 : i32
    %c0_i32_1 = arith.constant 0 : i32
    return %arg0, %c0_i32, %c0_i32_0 : i32, i32, i32
  }
  func.func @transform_2(%arg0: i32, %arg1: i32, %arg2: i32) -> (i32, i32, i32) {
    %c0_i32 = arith.constant 0 : i32
    %c0_i32_0 = arith.constant 0 : i32
    %c0_i32_1 = arith.constant 0 : i32
    return %arg0, %c0_i32, %c0_i32_0 : i32, i32, i32
  }
  func.func @transform_3(%arg0: i32, %arg1: i32, %arg2: i32) -> (i32, i32, i32) {
    %c0_i32 = arith.constant 0 : i32
    %c0_i32_0 = arith.constant 0 : i32
    %c0_i32_1 = arith.constant 0 : i32
    %c0_i32_2 = arith.constant 0 : i32
    return %c0_i32, %c0_i32_0, %c0_i32_1 : i32, i32, i32
  }
  func.func @transform_4(%arg0: i32, %arg1: i32, %arg2: i32) -> (i32, i32, i32) {
    %c0_i32 = arith.constant 0 : i32
    %c0_i32_0 = arith.constant 0 : i32
    %c0_i32_1 = arith.constant 0 : i32
    %c0_i32_2 = arith.constant 0 : i32
    return %c0_i32, %c0_i32_0, %c0_i32_1 : i32, i32, i32
  }
  func.func @transform_5(%arg0: i32, %arg1: i32, %arg2: i32) -> (i32, i32, i32) {
    %c0_i32 = arith.constant 0 : i32
    %c0_i32_0 = arith.constant 0 : i32
    %c0_i32_1 = arith.constant 0 : i32
    %c0_i32_2 = arith.constant 0 : i32
    return %c0_i32, %c0_i32_0, %c0_i32_1 : i32, i32, i32
  }
  func.func @transform_6(%arg0: i32, %arg1: i32, %arg2: i32) -> (i32, i32, i32) {
    %c0_i32 = arith.constant 0 : i32
    %c0_i32_0 = arith.constant 0 : i32
    %c0_i32_1 = arith.constant 0 : i32
    %c0_i32_2 = arith.constant 0 : i32
    return %c0_i32, %c0_i32_0, %c0_i32_1 : i32, i32, i32
  }
  func.func @transform_7(%arg0: i32, %arg1: i32, %arg2: i32) -> (i32, i32, i32) {
    %c0_i32 = arith.constant 0 : i32
    %c0_i32_0 = arith.constant 0 : i32
    %c0_i32_1 = arith.constant 0 : i32
    %c0_i32_2 = arith.constant 0 : i32
    return %c0_i32, %c0_i32_0, %c0_i32_1 : i32, i32, i32
  }
  func.func @transform_8(%arg0: i32, %arg1: i32, %arg2: i32) -> (i32, i32, i32) {
    %c0_i32 = arith.constant 0 : i32
    %c0_i32_0 = arith.constant 0 : i32
    %c0_i32_1 = arith.constant 0 : i32
    %c0_i32_2 = arith.constant 0 : i32
    return %c0_i32, %c0_i32_0, %c0_i32_1 : i32, i32, i32
  }
  func.func @transform_9(%arg0: i32, %arg1: i32, %arg2: i32) -> (i32, i32, i32) {
    %c0_i32 = arith.constant 0 : i32
    %c0_i32_0 = arith.constant 0 : i32
    %c0_i32_1 = arith.constant 0 : i32
    %c0_i32_2 = arith.constant 0 : i32
    return %c0_i32, %c0_i32_0, %c0_i32_1 : i32, i32, i32
  }
  func.func @transform_10(%arg0: i32, %arg1: i32, %arg2: i32) -> (i32, i32) {
    %c0_i32 = arith.constant 0 : i32
    %c0_i32_0 = arith.constant 0 : i32
    %c0_i32_1 = arith.constant 0 : i32
    return %c0_i32, %c0_i32_0 : i32, i32
  }
  func.func @transform_11(%arg0: i32, %arg1: i32, %arg2: i32) -> (i32, i32, i32) {
    %c0_i32 = arith.constant 0 : i32
    %c0_i32_0 = arith.constant 0 : i32
    return %arg0, %arg1, %c0_i32 : i32, i32, i32
  }
  func.func @transform_12(%arg0: i32, %arg1: i32, %arg2: i32) -> (i32, i32, i32, i32) {
    %c0_i32 = arith.constant 0 : i32
    %c0_i32_0 = arith.constant 0 : i32
    return %arg0, %arg2, %arg1, %c0_i32 : i32, i32, i32, i32
  }
}

</mosaic_0001>

<bundles_post_ra>
// kernel: tpu_custom_call.1
= control target key start
LH: loop header
LB: loop body
LE: loop exit
PB: predicated region body
PF: predicated region fallthrough
CT: control target
= control target key end

     0   :  { %s2770_s0 = inlined_call_operand.hbm [shape: bf16[2,8,32], index: 0, kind: input, shape index: {}]   ;;  %s2771_s1 = inlined_call_operand.hbm [shape: bf16[2,8,32], index: 1, kind: input, shape index: {}]   ;;  %s2772_s2 = inlined_call_operand.hbm [shape: bf16[2,8,32], index: 2, kind: input, shape index: {}]   ;;  %s2773_s3 = inlined_call_operand.hbm [shape: bf16[1,32,32], index: 3, kind: input, shape index: {}]   ;;  %s2774_s4 = inlined_call_operand.vmem [shape: f32[1,1,32], index: 4, kind: input, shape index: {}]   ;;  %s2775_s5 = inlined_call_operand.vmem [shape: bf16[1,32,32], index: 5, kind: input, shape index: {}]   ;;  %s2776_s6 = inlined_call_operand.vmem [shape: f32[1,1,32], index: 6, kind: input, shape index: {}]   ;;  %s2777_s7 = inlined_call_operand.hbm [shape: bf16[1,32,32], index: 7, kind: input, shape index: {}]   ;;  %s2778_s8 = inlined_call_operand.hbm [shape: f32[1,1,32], index: 8, kind: input, shape index: {}]   ;;  %s2779_s9 = inlined_call_operand.vmem [shape: bf16[1,32,32], index: 9, kind: input, shape index: {}]   ;;  %s2780_s10 = inlined_call_operand.vmem [shape: f32[1,32], index: 10, kind: input, shape index: {}]   ;;  %s2781_s11 = inlined_call_operand.hbm [shape: f32[2,8,32], index: 11, kind: output, shape index: {0}]   ;;  %s2782_s12 = inlined_call_operand.hbm [shape: bf16[2,4,8,8], index: 12, kind: output, shape index: {1}]  }
   0x1   :  { %2810 = sst [smem:[#allocation31_spill]] %s2771_s1 }
   0x2   :  { %2811 = sst [smem:[#allocation32_spill]] %s2773_s3 }
   0x3   :  { %2812 = sst [smem:[#allocation33_spill]] %s2774_s4 }
   0x4   :  { %2813 = sst [smem:[#allocation34_spill]] %s2776_s6 }
   0x5   :  { %2814 = sst [smem:[#allocation35_spill]] %s2779_s9 }
   0x6   :  { %2815 = sst [smem:[#allocation36_spill]] %s2780_s10 }
   0x7   :  { %2816 = sst [smem:[#allocation37_spill]] %s2781_s11 }
   0x8   :  { %2817 = sst [smem:[#allocation38_spill]] %s2782_s12 }
   0x9   :  { %18 = vsyncpa [#allocation4], 0 }
   0xa   :  { %20 = vsyncpa [#allocation4 + $0x1], 0 }
   0xb   :  { %21 = vsyncpa [#allocation7], 0 }
   0xc   :  { %23 = vsyncpa [#allocation7 + $0x1], 0 }
   0xd   :  { %24 = vsyncpa [#allocation10], 0 }
   0xe   :  { %25 = vsyncpa [#allocation13], 0 }
   0xf   :  { %26 = vsyncpa [#allocation5], 0 }
  0x10   :  { %28 = vsyncpa [#allocation5 + $0x1], 0 }
  0x11   :  { %29 = vsyncpa [#allocation16], 0 }
  0x12   :  { %31 = vsyncpa [#allocation16 + $0x1], 0  ;;  %s2282_s21 = smov 0   ;;  %s2284_s22 = smov 0  }
  0x13   :  { %s2286_s23 = smov 0   ;;  %s2288_s24 = smov 0  }
  0x14   :  { %s2290_s25 = smov 0   ;;  %s2292_s26 = smov 0  }
  0x15 LB: > { %2818 = sst [smem:[#allocation23_spill]] %s2175_s21  ;;  %s2313_s27 = sadd.s32 4294967295, %s2195_s26   ;;  %s2195_s26 = sphi %s2292_s26, %s37_s26   ;;  %s2191_s25 = sphi %s2290_s25, %s2868_s25   ;;  %s2187_s24 = sphi %s2288_s24, %s2867_s24   ;;  %s2183_s23 = sphi %s2286_s23, %s2871_s23   ;;  %s2179_s22 = sphi %s2284_s22, %s2870_s22   ;;  %s2175_s21 = sphi %s2282_s21, %s2869_s21  }
  0x16   : > { %2819 = sst [smem:[#allocation24_spill]] %s2187_s24  ;;  %s1587_s28 = sadd.s32 4294967294, %s2195_s26  }
  0x17   : > { %2820 = sst [smem:[#allocation25_spill]] %s2191_s25  ;;  %p78_p0 = scmp.ne.s32.totalorder %s2179_s22, %s2175_s21 }
  0x18   : > { %2821 = sst [smem:[#allocation26_spill]] %s2195_s26  ;;  %p2786_p1 = scmp.eq.s32.totalorder %s2313_s27, 0 }
  0x19   : > { %p330_p3 = scmp.eq.s32.totalorder %s1587_s28, 1  ;;  %p1588_p5 = scmp.ge.s32.totalorder %s2195_s26, 1 }
  0x1a   : > { %p2322_p4 = por %p2786_p1, %p78_p0  ;;  %p367_p7 = scmp.lt.s32.totalorder %s2195_s26, 3 }
  0x1b   : > { %p2327_p6 = por %p330_p3, %p78_p0  ;;  %s2197_s14 = smov [#allocation9]  }
  0x1c   : > { %s2822_s29 = scalar_select %p2322_p4, 1, 0 }
  0x1d   : > { %s2823_s30 = scalar_select %p2327_p6, 1, 0 }
  0x1e   : > { %p2332_p8 = pnand %p1588_p5, %p367_p7  ;;  %s379_s15 = sshll.u32 %s2197_s14, 4  ;;  %s380_s15 = int_to_ptr.vmem [resolvable:$true] %s379_s15 }
  0x1f   : > { %2824 = sst [smem:[#allocation27_spill]] %s2823_s30  ;;  %s56_s17 = sadd.s32 1, %s2191_s25 }
  0x20   : > { %s2825_s13 = scalar_select %p2332_p8, 1, 0 }
  0x21   : > { %p1773_p9 = pneg %p2332_p8  ;;  %s2827_s3 = sld [smem:[#allocation32_spill]] }
  0x23   : > { %p2341_p11 = pnand %p1773_p9, %p2786_p1 }
  0x25   : > { %s2826_s16 = scalar_select %p2341_p11, 1, 0 }
  0x26   : > { %p2354_p13 = pneg %p2341_p11 }
  0x27   : > { %s1895_s20 = scalar_lea.hbm %s2827_s3, 256 }
  0x28   : > { %p1896_p12 = scmp.ne.s32.totalorder %s2827_s3, %s1895_s20  ;;  %p1902_p5 = scmp.lt.u32.totalorder %s1895_s20, %s2827_s3 }
  0x29   : > { %s2828_s14 = scalar_select %p2354_p13, 1, 0 }
  0x2a   : > { %p1898_p0 = pnand %p2354_p13, %p1896_p12 }
  0x2c   : > { %p1899_p3 = pneg %p1898_p0 }
  0x2e   : > { %p1904_p7 = pnand %p1902_p5, %p1899_p3 }
  0x30   : > { %1907 = shalt.err (!%p1904_p7)
}
  0x31   : > { %s1908_s18 = scalar_lea.vmem %s380_s15, 256  ;;  %p1916_p2 = scmp.lt.s32.totalorder %s380_s15, %s380_s15 }
  0x32   : > { %p1909_p9 = scmp.ne.s32.totalorder %s380_s15, %s1908_s18  ;;  %p1917_p6 = scmp.lt.s32.totalorder %s1908_s18, %s1908_s18 }
  0x34   : > { %p1911_p10 = pnand %p1909_p9, %p2354_p13  ;;  %p1918_p4 = por %p1917_p6, %p1916_p2 }
  0x36   : > { %p1912_p1 = pneg %p1911_p10 }
  0x38   : > { %p1919_p8 = pnand %p1918_p4, %p1912_p1 }
  0x3a   : > { %1922 = shalt.err (!%p1919_p8)
}
  0x3b   : > { %s2789_s30 = smov 64   ;;  %s2790_s11 = smov 4  }
  0x3c   : > { %1776 = dma.hbm_to_vmem [thread:$0]  (!%p2341_p11), %s2827_s3, 256, %s380_s15, [#allocation10], %s2789_s30, %s2789_s30, %s2790_s11  }
  0x3d   : > { %p58_p1 = scmp.ge.s32.totalorder %s56_s17, 2  ;;  %s65_s20 = sadd.s32 1, %s2183_s23 }
  0x3e   : > { %p72_p2 = scmp.ne.s32.totalorder %s2183_s23, %s2179_s22  ;;  %p73_p4 = scmp.eq.s32.totalorder %s2195_s26, 0 }
  0x3f   : > { %s2873_s17 = smov (%p58_p1, %s56_s17), 0  ;;  %p2830_p8 = scmp.eq.s32.totalorder %s2313_s27, 1 }
  0x40   : > { %2829 = sst [smem:[#allocation28_spill]] %s2873_s17  ;;  %p74_p6 = por %p73_p4, %p72_p2 }
  0x41   : > { %p2381_p10 = por %p2830_p8, %p72_p2  ;;  %s60_s18 = ssub.s32 %s2191_s25, %s2873_s17 }
  0x42   : > { %p1803_p12 = scmp.lt.s32.totalorder %s2195_s26, 2  ;;  %p63_p0 = scmp.eq.s32.totalorder %s60_s18, 0 }
  0x43   : > { %s2831_s28 = scalar_select %p2381_p10, 1, 0 }
  0x44   : > { %s2792_s10 = sand.u32 1, %s2183_s23   ;;  %s2394_s21 = sshll.u32 %s2191_s25, 6 }
  0x45   : > { %2832 = sst [smem:[#allocation29_spill]] %s2831_s28  ;;  %s2391_s15 = sshll.u32 %s2792_s10, 2 }
  0x46   : > { %s2397_s19 = scalar_select %p63_p0, %s2183_s23, %s65_s20  }
  0x47   : > { %p2399_p3 = pnand %p1803_p12, %p74_p6  ;;  %s451_s11 = sand.u32 1, %s2195_s26  }
  0x48   : > { %2833 = sst [smem:[#allocation30_spill]] %s2397_s19  ;;  %s2835_s1 = sld [smem:[#allocation31_spill]] }
  0x49   : > { %s2834_s30 = scalar_select %p2399_p3, 1, 0 }
  0x4a   : > { %s455_s10 = scalar_lea.vmem [#allocation6], %s2391_s15  ;;  %s2200_s20 = smov [#allocation11]  }
  0x4b   : > { %s462_s25 = sshll.u32 %s455_s10, 4  ;;  %s2413_s19 = sshll.u32 %s2200_s20, 4  ;;  %s2411_s25 = int_to_ptr.vmem [resolvable:$true] %s462_s25  ;;  %s402_s19 = int_to_ptr.vmem [resolvable:$true] %s2413_s19 }
  0x4c   : > { %s2415_s12 = scalar_lea.sflag [#allocation7], %s451_s11  ;;  %p2421_p7 = pneg %p2399_p3 }
  0x4e   : > { %s2408_s18 = scalar_lea.hbm %s2835_s1, %s2394_s21  ;;  %s1928_s26 = scalar_lea.hbm %s2835_s1, 128 }
  0x4f   : > { %s1923_s28 = scalar_lea.hbm %s2408_s18, 64  ;;  %p1929_p2 = scmp.lt.u32.totalorder %s2408_s18, %s2835_s1 }
  0x50   : > { %p1924_p5 = scmp.ne.s32.totalorder %s2408_s18, %s1923_s28  ;;  %p1930_p4 = scmp.lt.u32.totalorder %s1928_s26, %s1923_s28 }
  0x51   : > { %s2836_s3 = scalar_select %p2421_p7, 1, 0 }
  0x52   : > { %p1926_p9 = pnand %p2421_p7, %p1924_p5  ;;  %p1931_p6 = por %p1930_p4, %p1929_p2 }
  0x53   : > { %p1932_p8 = scmp.lt.u32.totalorder %s1923_s28, %s2408_s18 }
  0x54   : > { %p1927_p1 = pneg %p1926_p9 }
  0x55   : > { %p1933_p12 = por %p1932_p8, %p1931_p6 }
  0x57   : > { %p1934_p0 = pnand %p1933_p12, %p1927_p1 }
  0x59   : > { %1937 = shalt.err (!%p1934_p0)
}
  0x5a   : > { %s1938_s11 = scalar_lea.vmem %s2411_s25, 64  ;;  %s2201_s17 = smov [#allocation6]  }
  0x5b   : > { %p1939_p5 = scmp.ne.s32.totalorder %s2411_s25, %s1938_s11  ;;  %s1943_s10 = sshll.u32 %s2201_s17, 4  ;;  %s1944_s10 = int_to_ptr.vmem [resolvable:$false] %s1943_s10 }
  0x5c   : > { %s1945_s24 = scalar_lea.vmem %s1944_s10, 128  ;;  %p1946_p11 = scmp.lt.s32.totalorder %s2411_s25, %s1944_s10 }
  0x5d   : > { %p1941_p9 = pnand %p1939_p5, %p2421_p7  ;;  %p1947_p13 = scmp.lt.s32.totalorder %s1945_s24, %s1938_s11 }
  0x5f   : > { %p1942_p10 = pneg %p1941_p9  ;;  %p1948_p2 = por %p1947_p13, %p1946_p11 }
  0x61   : > { %p1949_p4 = pnand %p1948_p2, %p1942_p10 }
  0x63   : > { %1952 = shalt.err (!%p1949_p4)
}
  0x64   : > { %1789 = dma.hbm_to_vmem [thread:$0]  (!%p2399_p3), %s2408_s18, 64, %s2411_s25, %s2415_s12  }
  0x65   : > { %s1953_s20 = scalar_lea.hbm %s2777_s7, 256  ;;  %p2837_p11 = scmp.ne.s32.totalorder %s2828_s14, 0 }
  0x66   : > { %p1954_p1 = scmp.ne.s32.totalorder %s2777_s7, %s1953_s20  ;;  %p1960_p6 = scmp.lt.u32.totalorder %s1953_s20, %s2777_s7 }
  0x68   : > { %p1956_p13 = pnand %p1954_p1, %p2837_p11 }
  0x6a   : > { %p1957_p10 = pneg %p1956_p13 }
  0x6c   : > { %p1962_p8 = pnand %p1960_p6, %p1957_p10 }
  0x6e   : > { %1965 = shalt.err (!%p1962_p8)
}
  0x6f   : > { %s1966_s24 = scalar_lea.vmem %s402_s19, 256  ;;  %p1974_p9 = scmp.lt.s32.totalorder %s402_s19, %s402_s19 }
  0x70   : > { %p1967_p12 = scmp.ne.s32.totalorder %s402_s19, %s1966_s24  ;;  %p1975_p2 = scmp.lt.s32.totalorder %s1966_s24, %s1966_s24 }
  0x72   : > { %p1969_p0 = pnand %p1967_p12, %p2837_p11  ;;  %p1976_p4 = por %p1975_p2, %p1974_p9 }
  0x74   : > { %p1970_p5 = pneg %p1969_p0 }
  0x76   : > { %p1977_p3 = pnand %p1976_p4, %p1970_p5 }
  0x78   : > { %1980 = shalt.err (!%p1977_p3)
}
  0x79   : > { %p2838_p1 = scmp.ne.s32.totalorder %s2826_s16, 0  ;;  %s2839_s1 = smov 4  }
  0x7a   : > { %s2840_s25 = smov 64   ;;  %s2202_s28 = smov [#allocation12]  }
  0x7b   : > { %1779 = dma.hbm_to_vmem [thread:$0]  (!%p2838_p1), %s2777_s7, 256, %s402_s19, [#allocation10], %s2840_s25, %s2840_s25, %s2839_s1  }
  0x7c   : > { %s415_s20 = sshll.u32 %s2202_s28, 4  ;;  %s1981_s10 = scalar_lea.hbm %s2778_s8, 16  ;;  %s416_s20 = int_to_ptr.vmem [resolvable:$true] %s415_s20 }
  0x7d   : > { %p1982_p3 = scmp.ne.s32.totalorder %s2778_s8, %s1981_s10  ;;  %p1988_p6 = scmp.lt.u32.totalorder %s1981_s10, %s2778_s8 }
  0x7f   : > { %p1984_p13 = pnand %p1982_p3, %p2837_p11 }
  0x81   : > { %p1985_p10 = pneg %p1984_p13 }
  0x83   : > { %p1990_p8 = pnand %p1988_p6, %p1985_p10 }
  0x85   : > { %1993 = shalt.err (!%p1990_p8)
}
  0x86   : > { %s1994_s19 = scalar_lea.vmem %s416_s20, 16  ;;  %s2001_s1 = scalar_lea.vmem %s416_s20, 32 }
  0x87   : > { %p1995_p12 = scmp.ne.s32.totalorder %s416_s20, %s1994_s19  ;;  %p2002_p9 = scmp.lt.s32.totalorder %s416_s20, %s416_s20 }
  0x88   : > { %p2003_p2 = scmp.lt.s32.totalorder %s2001_s1, %s1994_s19 }
  0x89   : > { %p1997_p0 = pnand %p1995_p12, %p2837_p11 }
  0x8a   : > { %p2004_p4 = por %p2003_p2, %p2002_p9 }
  0x8b   : > { %p1998_p5 = pneg %p1997_p0 }
  0x8d   : > { %p2005_p7 = pnand %p2004_p4, %p1998_p5 }
  0x8f   : > { %2008 = shalt.err (!%p2005_p7)
}
  0x90   : > { %1782 = dma.hbm_to_vmem [thread:$0]  (!%p2838_p1), %s2778_s8, 16, %s416_s20, [#allocation13]  }
  0x91   : > { %s2489_s14 = scalar_lea.hbm %s2770_s0, %s2394_s21  ;;  %s436_s18 = scalar_lea.vmem [#allocation3], %s2391_s15 }
  0x92   : > { %s444_s26 = sshll.u32 %s436_s18, 4  ;;  %s2841_s16 = sand.u32 1, %s2183_s23   ;;  %s445_s26 = int_to_ptr.vmem [resolvable:$true] %s444_s26 }
  0x93   : > { %s433_s28 = scalar_lea.sflag [#allocation4], %s2841_s16  ;;  %s2009_s17 = scalar_lea.hbm %s2489_s14, 64 }
  0x94   : > { %p2010_p7 = scmp.ne.s32.totalorder %s2489_s14, %s2009_s17  ;;  %p2842_p11 = scmp.ne.s32.totalorder %s2836_s3, 0 }
  0x95   : > { %s2014_s10 = scalar_lea.hbm %s2770_s0, 128  ;;  %p2015_p1 = scmp.lt.u32.totalorder %s2489_s14, %s2770_s0 }
  0x96   : > { %p2012_p3 = pnand %p2010_p7, %p2842_p11  ;;  %p2016_p10 = scmp.lt.u32.totalorder %s2014_s10, %s2009_s17 }
  0x97   : > { %p2018_p8 = scmp.lt.u32.totalorder %s2009_s17, %s2489_s14 }
  0x98   : > { %p2013_p13 = pneg %p2012_p3  ;;  %p2017_p6 = por %p2016_p10, %p2015_p1 }
  0x9a   : > { %p2019_p12 = por %p2018_p8, %p2017_p6 }
  0x9c   : > { %p2020_p0 = pnand %p2019_p12, %p2013_p13 }
  0x9e   : > { %2023 = shalt.err (!%p2020_p0)
}
  0x9f   : > { %s2024_s1 = scalar_lea.vmem %s445_s26, 64  ;;  %s2203_s9 = smov [#allocation3]  }
  0xa0   : > { %p2025_p5 = scmp.ne.s32.totalorder %s445_s26, %s2024_s1  ;;  %s2029_s25 = sshll.u32 %s2203_s9, 4  ;;  %s2030_s25 = int_to_ptr.vmem [resolvable:$false] %s2029_s25 }
  0xa1   : > { %s2031_s4 = scalar_lea.vmem %s2030_s25, 128  ;;  %p2032_p4 = scmp.lt.s32.totalorder %s445_s26, %s2030_s25 }
  0xa2   : > { %p2027_p9 = pnand %p2025_p5, %p2842_p11  ;;  %p2033_p7 = scmp.lt.s32.totalorder %s2031_s4, %s2024_s1 }
  0xa4   : > { %p2028_p2 = pneg %p2027_p9  ;;  %p2034_p3 = por %p2033_p7, %p2032_p4 }
  0xa6   : > { %p2035_p1 = pnand %p2034_p3, %p2028_p2 }
  0xa8   : > { %2038 = shalt.err (!%p2035_p1)
}
  0xa9   : > { %p2843_p10 = scmp.ne.s32.totalorder %s2834_s30, 0  ;;  %s2515_s16 = scalar_lea.hbm %s2772_s2, %s2394_s21 }
  0xaa   : > { %s473_s17 = scalar_lea.vmem [#allocation8], %s2391_s15  ;;  %s2039_s11 = scalar_lea.hbm %s2515_s16, 64 }
  0xab   : > { %1786 = dma.hbm_to_vmem [thread:$0]  (!%p2843_p10), %s2489_s14, 64, %s445_s26, %s433_s28  }
  0xac   : > { %s480_s20 = sshll.u32 %s473_s17, 4  ;;  %p2040_p13 = scmp.ne.s32.totalorder %s2515_s16, %s2039_s11  ;;  %s481_s20 = int_to_ptr.vmem [resolvable:$true] %s480_s20 }
  0xad   : > { %s2044_s14 = scalar_lea.hbm %s2772_s2, 128  ;;  %p2045_p12 = scmp.lt.u32.totalorder %s2515_s16, %s2772_s2 }
  0xae   : > { %p2042_p6 = pnand %p2040_p13, %p2842_p11  ;;  %p2046_p0 = scmp.lt.u32.totalorder %s2044_s14, %s2039_s11 }
  0xaf   : > { %p2048_p9 = scmp.lt.u32.totalorder %s2039_s11, %s2515_s16 }
  0xb0   : > { %p2043_p8 = pneg %p2042_p6  ;;  %p2047_p5 = por %p2046_p0, %p2045_p12 }
  0xb2   : > { %p2049_p2 = por %p2048_p9, %p2047_p5 }
  0xb4   : > { %p2050_p4 = pnand %p2049_p2, %p2043_p8 }
  0xb6   : > { %2053 = shalt.err (!%p2050_p4)
}
  0xb7   : > { %s2054_s15 = scalar_lea.vmem %s481_s20, 64  ;;  %s2204_s21 = smov [#allocation8]  }
  0xb8   : > { %p2055_p7 = scmp.ne.s32.totalorder %s481_s20, %s2054_s15  ;;  %s2059_s19 = sshll.u32 %s2204_s21, 4  ;;  %s2060_s19 = int_to_ptr.vmem [resolvable:$false] %s2059_s19 }
  0xb9   : > { %s2061_s1 = scalar_lea.vmem %s2060_s19, 128  ;;  %p2062_p13 = scmp.lt.s32.totalorder %s481_s20, %s2060_s19 }
  0xba   : > { %p2057_p3 = pnand %p2055_p7, %p2842_p11  ;;  %p2063_p6 = scmp.lt.s32.totalorder %s2061_s1, %s2054_s15 }
  0xbc   : > { %p2058_p1 = pneg %p2057_p3  ;;  %p2064_p10 = por %p2063_p6, %p2062_p13 }
  0xbe   : > { %p2065_p0 = pnand %p2064_p10, %p2058_p1 }
  0xc0   : > { %2068 = shalt.err (!%p2065_p0)
}
  0xc1   : > { %p2844_p12 = scmp.ne.s32.totalorder %s2834_s30, 0  ;;  %p2845_p8 = scmp.ne.s32.totalorder %s2825_s13, 0 }
  0xc2   : > { %s2539_s3 = sand.u32 (!%p2845_p8), 1, %s2179_s22   ;;  %p2846_p11 = scmp.ne.s32.totalorder (!%p2845_p8), %s2822_s29, 0 }
  0xc3   : > { %1792 = dma.hbm_to_vmem [thread:$0]  (!%p2844_p12), %s2515_s16, 64, %s481_s20, %s2415_s12  }
  0xc4   : > { %489 = sbr.rel (%p2845_p8) target bundleno = 1676 (0x68c), region = 64  ;;  %s2542_s9 = sshll.u32 (!%p2845_p8), %s2539_s3, 2 }
  0xc5   : > { %s492_s25 = scalar_lea.sflag (!%p2845_p8), [#allocation4], %s2539_s3  ;;  %s495_s4 = scalar_lea.vmem (!%p2845_p8), [#allocation3], %s2542_s9 }
  0xcb   : > { %2150 = dma.done.wait (%p2846_p11), %s492_s25, 64  }
  0xcc   : > { %2152 = vsyncadd (%p2846_p11), %s492_s25, 4294967232  ;;  %s500_s12 = sand.u32 1, %s2313_s27   ;;  %s504_s30 = scalar_lea.vmem [#allocation6], %s2542_s9 }
  0xcd   : > { %s501_s13 = scalar_lea.sflag [#allocation7], %s500_s12 }
  0xce   : > { %2154 = dma.done.wait (%p2846_p11), %s501_s13, 128  }
  0xcf   : > { %2156 = vsyncadd (%p2846_p11), %s501_s13, 4294967168  ;;  %s513_s6 = scalar_lea.vmem [#allocation8], %s2542_s9  ;;  %p2847_p10 = scmp.eq.s32.totalorder %s2313_s27, 0 }
  0xd1   : > { %2158 = dma.done.wait (%p2847_p10), [#allocation10], 512   ;;  %p2848_p5 = pmov %p2847_p10 }
  0xd3   : > { %2160 = vsyncadd (%p2848_p5), [#allocation10], 4294966784  ;;  %p2849_p9 = pmov %p2848_p5 }
  0xd4   : > { %p2850_p2 = pmov %p2848_p5 }
  0xd5   : > { %2162 = dma.done.wait (%p2849_p9), [#allocation13], 16  }
  0xd6   : > { %2164 = vsyncadd (%p2850_p2), [#allocation13], 4294967280  ;;  %vm631_vm0 = vcmask 261120   ;;  %v2205_v0 = vmov 0.0   ;;  %vm2206_vm1 = vmmov 0   ;;  %v1871_v1 = vld [vmem:[%s2775_s5] sm:$0xff]  }
  0xd7   : > { %1679 = vmatprep.subr.bf16.mxu1 %v2205_v0  ;;  %1671 = vmatprep.subr.bf16.mxu0 %v2205_v0  ;;  %1273 = vst.msk [vmem:[#allocation2] sm:$0xff] %vm631_vm0, %v2205_v0  ;;  %v1872_v2 = vld [vmem:[#allocation9] sm:$0xff]   ;;  %v1873_v3 = vld [vmem:[%s2775_s5 + $0x8] sm:$0xff]   ;;  %v584_v4 = vld [vmem:[%s504_s30] sm:$0xf]  ;;  %s2851_s11 = sld [smem:[#allocation34_spill]] }
  0xd8   : > { %1683 = vmatprep.mubr.msk.bf16.mxu1 %vm2206_vm1, %v2205_v0  ;;  %1675 = vmatprep.mubr.msk.bf16.mxu0 %vm2206_vm1, %v2205_v0  ;;  %v1874_v5 = vld [vmem:[#allocation9 + $0x8] sm:$0xff]   ;;  %s2852_s14 = sld [smem:[#allocation33_spill]]  ;;  %vm804_vm2 = vcmask 64512   ;;  %s2207_s26 = smov 112   ;;  %v1875_v22 = vld [vmem:[#allocation11] sm:$0xff]   ;;  %v1876_v23 = vld [vmem:[#allocation11 + $0x8] sm:$0xff]  }
  0xd9   : > { %1680 = vmatpush3.bf16.msra.mxu1 %v1871_v1  ;;  %1672 = vmatpush3.bf16.msra.mxu0 %v1872_v2  ;;  %v583_v6 = vld [vmem:[%s495_s4] sm:$0xf]  ;;  %s2208_s28 = smov 120   ;;  %s2209_s15 = smov 104   ;;  %v585_v24 = vld [vmem:[%s513_s6] sm:$0xf] }
  0xda   : > { %1681 = vmatprep.subr.bf16.mxu1 %v2205_v0  ;;  %1673 = vmatprep.subr.bf16.mxu0 %v2205_v0  ;;  %v1616_v39 = vld [vmem:[#allocation12] ss:$0 sm:$0xff]  ;;  %vm868_vm3 = vcmask 1043456   ;;  %s1607_s21 = sshll.u32 %s2539_s3, 4  ;;  %vm863_vm4 = vcmask 60416   ;;  %s2853_s25 = sld [smem:[#allocation35_spill]] }
  0xdb   : > { %s2645_s19 = scalar_lea.vmem [#allocation15], %s1607_s21  ;;  %s2210_s12 = smov 8   ;;  %vm1264_vm5 = vcmask 130048   ;;  %vm1266_vm6 = vcmask 195584  }
  0xdc   : > { %s2211_s6 = smov 16   ;;  %s2855_s29 = sld [smem:[#allocation24_spill]] }
  0xdd   : > { %1682 = vmatpush3.bf16.msra.mxu1 %v1873_v3  ;;  %1674 = vmatpush3.bf16.msra.mxu0 %v1874_v5  ;;  %v1612_v7 = vld [vmem:[%s2851_s11] ss:$0 sm:$0xff]  ;;  %s2212_s27 = smov 24   ;;  %s2856_s18 = sld [smem:[#allocation29_spill]] }
  0xde   : > { %1695 = vmatprep.subr.bf16.mxu1 %v2205_v0  ;;  %1687 = vmatprep.subr.bf16.mxu0 %v2205_v0  ;;  %v1608_v8 = vld [vmem:[%s2852_s14] ss:$0 sm:$0xff]  ;;  %s1381_s17 = sshll.u32 %s2645_s19, 4  ;;  %s2857_s10 = sld [smem:[#allocation38_spill]]  ;;  %s2685_s17 = int_to_ptr.vmem [resolvable:$true] %s1381_s17 }
  0xdf   : > { %s1351_s14 = scalar_lea.sflag [#allocation16], %s2539_s3 }
  0xe0   : > { %1684 = vmatmul.mubr.msk.bf16.vlgmr.msra.gmra.mrb[0].mxu1 %vm631_vm0, %v584_v4  ;;  %1676 = vmatmul.mubr.msk.bf16.vlgmr.msra.gmra.mrb[0].mxu0 %vm631_vm0, %v583_v6  ;;  %s2854_s4 = smov %s2853_s25 }
  0xe1   : > { %1697 = vmatprep.mubr.msk.bf16.mxu1 %vm2206_vm1, %v2205_v0  ;;  %1691 = vmatprep.mubr.msk.bf16.mxu0 %vm2206_vm1, %v2205_v0 }
  0xe2   : > { %1688 = vmatpush3.bf16.msra.mxu0 %v1875_v22  ;;  %s1642_s16 = sshll.u32 %s2855_s29, 8 }
  0xe3   : > { %1689 = vmatprep.subr.bf16.mxu0 %v2205_v0  ;;  %p2858_p7 = scmp.ne.s32.totalorder %s2856_s18, 0 }
  0xe4   : > { %s2683_s24 = scalar_lea.hbm %s2857_s10, %s1642_s16 }
  0xe6   : > { %1690 = vmatpush3.bf16.msra.mxu0 %v1876_v23 }
  0xe7   : > { %1701 = vmatprep.subr.bf16.mxu0 %v2205_v0 }
  0xe9   : > { %1692 = vmatmul.mubr.msk.bf16.vlgmr.msra.gmra.mrb[4].mxu0 %vm631_vm0, %v585_v24 }
  0xea   : > { %1703 = vmatprep.mubr.msk.bf16.mxu0 %vm2206_vm1, %v2205_v0 }
 0x1b3   : > { %v733_v9 = vpop.f32.mrb[0].mxu1  ;;  %v669_v12 = vpop.f32.mrb[0].mxu0 }
 0x1b4   : > { %v734_v10 = vadd.f32 %v1612_v7, %v733_v9  ;;  %v1685_v11 = vpop.f32.mrb[1].mxu1  ;;  %v670_v14 = vadd.f32 %v1608_v8, %v669_v12  ;;  %v1677_v15 = vpop.f32.mrb[1].mxu0 }
 0x1b5   : > { %v736_v13 = vpop.f32.mrb[2].mxu1  ;;  %v672_v18 = vpop.f32.mrb[2].mxu0 }
 0x1b6   : > { %v739_v16 = vpack.c.bf16 %v734_v10, %v734_v10  ;;  %v1686_v17 = vpop.f32.mrb[3].mxu1  ;;  %v1678_v19 = vpop.f32.mrb[3].mxu0  ;;  %v675_v20 = vpack.c.bf16 %v670_v14, %v670_v14 }
 0x1b8   : > { %1029 = vrot.lane.b32.xlu1 %v739_v16, %s2207_s26  ;;  %916 = vrot.lane.b32.xlu0 %v739_v16, %s2208_s28  ;;  %v809_v21 = vsel %vm804_vm2, %v739_v16, 0 }
 0x1b9   : > { %1696 = vmatpush3.bf16.xpose.msra.mxu1 %v809_v21 }
 0x1ba   : > { %1707 = vmatprep.subr.bf16.mxu1 %v2205_v0 }
 0x1bc   : > { %1027 = vrot.lane.b32.xlu1 %v675_v20, %s2207_s26  ;;  %913 = vrot.lane.b32.xlu0 %v675_v20, %s2208_s28  ;;  %v797_v40 = vpop.f32.mrb[4].mxu0 }
 0x1bd   : > { %v798_v41 = vadd.f32 %v1616_v39, %v797_v40  ;;  %v1693_v42 = vpop.f32.mrb[5].mxu0 }
 0x1be   : > { %v800_v43 = vpop.f32.mrb[6].mxu0 }
 0x1bf   : > { %v803_v44 = vpack.c.bf16 %v798_v41, %v798_v41  ;;  %v1694_v45 = vpop.f32.mrb[7].mxu0 }
 0x1c0   : > { %1139 = vrot.lane.b32.xlu1 %v675_v20, %s2209_s15  ;;  %1141 = vrot.lane.b32.xlu0 %v739_v16, %s2209_s15  ;;  %v1877_v45 = vld [vmem:[%s2853_s25] sm:$0xff]  }
 0x1c1   : > { %1698 = vmatmul.mubr.msk.bf16.vlgmr.msra.gmra.mrb[4].mxu1 %vm804_vm2, %v675_v20  ;;  %v870_v46 = vsel %vm868_vm3, %v803_v44, 0 }
 0x1c2   : > { %1709 = vmatprep.mubr.msk.bf16.mxu1 %vm2206_vm1, %v2205_v0  ;;  %1702 = vmatpush3.bf16.msra.mxu0 %v870_v46 }
 0x1c3   : > { %1713 = vmatprep.subr.bf16.mxu0 %v2205_v0 }
 0x22a   : > { %v917_v25 = vpop.permute.xlu0 %916  ;;  %v1030_v27 = vpop.permute.xlu1 %1029 }
 0x22b   : > { %v922_v26 = vsel %vm804_vm2, %v917_v25, 0  ;;  %v1035_v29 = vsel %vm804_vm2, %v1030_v27, 0 }
 0x22c   : > { %1708 = vmatpush3.bf16.xpose.msra.mxu1 %v922_v26 }
 0x22d   : > { %1719 = vmatprep.subr.bf16.mxu1 %v2205_v0 }
 0x22e   : > { %v914_v28 = vpop.permute.xlu0 %913  ;;  %v1028_v31 = vpop.permute.xlu1 %1027 }
 0x232   : > { %v1142_v30 = vpop.permute.xlu0 %1141  ;;  %v1140_v33 = vpop.permute.xlu1 %1139 }
 0x233   : > { %1710 = vmatmul.mubr.msk.bf16.vlgmr.msra.gmra.mrb[8].mxu1 %vm804_vm2, %v914_v28  ;;  %v1147_v32 = vsel %vm804_vm2, %v1142_v30, 0 }
 0x234   : > { %1720 = vmatpush3.bf16.xpose.msra.mxu1 %v1035_v29  ;;  %1721 = vmatprep.mubr.msk.bf16.mxu1 %vm2206_vm1, %v2205_v0 }
 0x235   : > { %1731 = vmatprep.subr.bf16.mxu1 %v2205_v0 }
 0x23b   : > { %1722 = vmatmul.mubr.msk.bf16.vlgmr.msra.gmra.mrb[12].mxu1 %vm804_vm2, %v1028_v31 }
 0x23c   : > { %1732 = vmatpush3.bf16.xpose.msra.mxu1 %v1147_v32  ;;  %1733 = vmatprep.mubr.msk.bf16.mxu1 %vm2206_vm1, %v2205_v0 }
 0x23d   : > { %1743 = vmatprep.subr.bf16.mxu1 %v2205_v0 }
 0x243   : > { %1734 = vmatmul.mubr.msk.bf16.vlgmr.msra.gmra.mrb[16].mxu1 %vm804_vm2, %v1140_v33 }
 0x244   : > { %1747 = vmatprep.mubr.msk.bf16.mxu1 %vm2206_vm1, %v2205_v0  ;;  %1744 = vmatpush3.bf16.msra.mxu1 %v1877_v45 }
 0x245   : > { %1745 = vmatprep.subr.bf16.mxu1 %v2205_v0 }
 0x294   : > { %v845_v34 = vpop.f32.mrb[4].mxu1 }
 0x295   : > { %v1699_v35 = vpop.f32.mrb[5].mxu1  ;;  %v851_v36 = vsel %vm804_vm2, %v845_v34, -inf }
 0x296   : > { %852 = vmax.xlane.f32.xlu0 %v851_v36  ;;  %v848_v37 = vpop.f32.mrb[6].mxu1 }
 0x297   : > { %v1700_v38 = vpop.f32.mrb[7].mxu1 }
 0x306   : > { %v958_v47 = vpop.f32.mrb[8].mxu1 }
 0x307   : > { %v1711_v48 = vpop.f32.mrb[9].mxu1  ;;  %v964_v49 = vsel %vm804_vm2, %v958_v47, -inf }
 0x308   : > { %965 = vmax.xlane.f32.xlu1 %v964_v49  ;;  %v961_v50 = vpop.f32.mrb[10].mxu1 }
 0x309   : > { %v1712_v51 = vpop.f32.mrb[11].mxu1  ;;  %v1878_v50 = vld [vmem:[%s2854_s4 + $0x8] sm:$0xff]  }
 0x30a   : > { %1746 = vmatpush3.bf16.msra.mxu1 %v1878_v50 }
 0x30e   : > { %v1071_v52 = vpop.f32.mrb[12].mxu1 }
 0x30f   : > { %v1723_v53 = vpop.f32.mrb[13].mxu1  ;;  %v1077_v54 = vsel %vm804_vm2, %v1071_v52, -inf }
 0x310   : > { %1078 = vmax.xlane.f32.xlu0 %v1077_v54  ;;  %v1074_v55 = vpop.f32.mrb[14].mxu1 }
 0x311   : > { %v1724_v56 = vpop.f32.mrb[15].mxu1 }
 0x316   : > { %v1183_v57 = vpop.f32.mrb[16].mxu1 }
 0x317   : > { %v1735_v58 = vpop.f32.mrb[17].mxu1  ;;  %v1189_v59 = vsel %vm804_vm2, %v1183_v57, -inf }
 0x318   : > { %1190 = vmax.xlane.f32.xlu0 %v1189_v59  ;;  %v1186_v60 = vpop.f32.mrb[18].mxu1 }
 0x319   : > { %v1736_v61 = vpop.f32.mrb[19].mxu1 }
 0x323   : > { %v853_v62 = vpop.xlane.xlu0 %852 }
 0x324   : > { %v854_v63 = vsub.f32 %v845_v34, %v853_v62 }
 0x326   : > { %v855_v1 = vmul.f32 1.442695, %v854_v63 }
 0x328   : > { %1879 = vpow2.f32 %v855_v1 }
 0x332   : > { %v1880_v2 = vpop.eup %1879 }
 0x333   : > { %v857_v3 = vsel %vm804_vm2, %v1880_v2, 0.0 }
 0x334   : > { %858 = vadd.xlane.f32.xlu1 %v857_v3 }
 0x345   : > { %979 = vrot.lane.b32.xlu1 %v803_v44, %s2208_s28  ;;  %s2213_s28 = smov [#allocation15]  }
 0x395   : > { %v966_v4 = vpop.xlane.xlu1 %965 }
 0x396   : > { %v967_v5 = vsub.f32 %v958_v47, %v966_v4 }
 0x398   : > { %v968_v6 = vmul.f32 1.442695, %v967_v5 }
 0x39a   : > { %1881 = vpow2.f32 %v968_v6 }
 0x39d   : > { %v1079_v7 = vpop.xlane.xlu0 %1078 }
 0x39e   : > { %v1080_v8 = vsub.f32 %v1071_v52, %v1079_v7 }
 0x3a0   : > { %v1081_v9 = vmul.f32 1.442695, %v1080_v8 }
 0x3a2   : > { %1883 = vpow2.f32 %v1081_v9 }
 0x3a4   : > { %v1882_v10 = vpop.eup %1881 }
 0x3a5   : > { %v1191_v11 = vpop.xlane.xlu0 %1190  ;;  %v970_v12 = vsel %vm804_vm2, %v1882_v10, 0.0 }
 0x3a6   : > { %v1192_v13 = vsub.f32 %v1183_v57, %v1191_v11  ;;  %971 = vadd.xlane.f32.xlu0 %v970_v12 }
 0x3a8   : > { %v1193_v14 = vmul.f32 1.442695, %v1192_v13 }
 0x3aa   : > { %1885 = vpow2.f32 %v1193_v14 }
 0x3ac   : > { %v1884_v15 = vpop.eup %1883 }
 0x3ad   : > { %v1083_v16 = vsel %vm804_vm2, %v1884_v15, 0.0 }
 0x3ae   : > { %1084 = vadd.xlane.f32.xlu1 %v1083_v16 }
 0x3b4   : > { %v1886_v17 = vpop.eup %1885 }
 0x3b5   : > { %v1195_v18 = vsel %vm804_vm2, %v1886_v17, 0.0 }
 0x3b6   : > { %1196 = vadd.xlane.f32.xlu0 %v1195_v18 }
 0x3bf   : > { %1203 = vrot.lane.b32.xlu1 %v803_v44, %s2209_s15  ;;  %s2073_s15 = sshll.u32 %s2213_s28, 4  ;;  %s2074_s15 = int_to_ptr.vmem [resolvable:$false] %s2073_s15 }
 0x3c0   : > { %s2075_s21 = scalar_lea.vmem %s2074_s15, 512  ;;  %p2076_p13 = scmp.lt.s32.totalorder %s2685_s17, %s2074_s15 }
 0x3c1   : > { %v859_v19 = vpop.xlane.xlu1 %858 }
 0x3c2   : > { %1887 = vrcp.f32 %v859_v19 }
 0x3c5   : > { %v980_v21 = vpop.permute.xlu1 %979 }
 0x3c6   : > { %v985_v24 = vsel %vm868_vm3, %v980_v21, 0 }
 0x3cc   : > { %v1888_v20 = vpop.eup %1887  ;;  %1091 = vrot.lane.b32.xlu0 %v803_v44, %s2207_s26  ;;  %s2069_s26 = scalar_lea.vmem %s2685_s17, 256 }
 0x3cd   : > { %v861_v22 = vmul.f32 %v1888_v20, %v1880_v2  ;;  %p2070_p4 = scmp.ne.s32.totalorder %s2685_s17, %s2069_s26  ;;  %p2077_p6 = scmp.lt.s32.totalorder %s2075_s21, %s2069_s26 }
 0x3cf   : > { %v862_v23 = vpack.c.bf16 %v861_v22, %v861_v22  ;;  %p2071_p3 = pnand %p2070_p4, %p2858_p7  ;;  %p2078_p0 = por %p2077_p6, %p2076_p13 }
 0x3d1   : > { %864 = vst.msk [vmem:[%s2645_s19] sm:$0xf] %vm863_vm4, %v862_v23  ;;  %1704 = vmatmul.mubr.msk.bf16.vlgmr.msra.gmra.mrb[8].mxu0 %vm804_vm2, %v862_v23  ;;  %p2072_p1 = pneg %p2071_p3 }
 0x3d2   : > { %1714 = vmatpush3.bf16.msra.mxu0 %v985_v24  ;;  %1715 = vmatprep.mubr.msk.bf16.mxu0 %vm2206_vm1, %v2205_v0 }
 0x3d3   : > { %1725 = vmatprep.subr.bf16.mxu0 %v2205_v0  ;;  %p2079_p12 = pnand %p2078_p0, %p2072_p1 }
 0x433   : > { %v972_v25 = vpop.xlane.xlu0 %971 }
 0x434   : > { %1889 = vrcp.f32 %v972_v25 }
 0x43b   : > { %v1085_v26 = vpop.xlane.xlu1 %1084 }
 0x43c   : > { %1891 = vrcp.f32 %v1085_v26 }
 0x43e   : > { %v1890_v27 = vpop.eup %1889 }
 0x43f   : > { %v974_v28 = vmul.f32 %v1890_v27, %v1882_v10  ;;  %v1204_v35 = vpop.permute.xlu1 %1203 }
 0x440   : > { %v1209_v37 = vsel %vm868_vm3, %v1204_v35, 0 }
 0x441   : > { %v975_v29 = vpack.c.bf16 %v974_v28, %v974_v28 }
 0x443   : > { %v1197_v30 = vpop.xlane.xlu0 %1196  ;;  %1623 = vst.msk [vmem:[%s2645_s19 + $0x4] sm:$0xf] %vm863_vm4, %v975_v29  ;;  %1716 = vmatmul.mubr.msk.bf16.vlgmr.msra.gmra.mrb[12].mxu0 %vm804_vm2, %v975_v29 }
 0x444   : > { %1893 = vrcp.f32 %v1197_v30  ;;  %1727 = vmatprep.mubr.msk.bf16.mxu0 %vm2206_vm1, %v2205_v0 }
 0x446   : > { %v1892_v31 = vpop.eup %1891 }
 0x447   : > { %v1087_v32 = vmul.f32 %v1892_v31, %v1884_v15  ;;  %v1092_v33 = vpop.permute.xlu0 %1091 }
 0x448   : > { %v1097_v34 = vsel %vm868_vm3, %v1092_v33, 0 }
 0x449   : > { %1726 = vmatpush3.bf16.msra.mxu0 %v1097_v34  ;;  %v1088_v36 = vpack.c.bf16 %v1087_v32, %v1087_v32 }
 0x44a   : > { %1737 = vmatprep.subr.bf16.mxu0 %v2205_v0 }
 0x44b   : > { %1626 = vst.msk [vmem:[%s2645_s19 + $0x8] sm:$0xf] %vm863_vm4, %v1088_v36 }
 0x44c   : > { %1728 = vmatmul.mubr.msk.bf16.vlgmr.msra.gmra.mrb[16].mxu0 %vm804_vm2, %v1088_v36 }
 0x44d   : > { %1738 = vmatpush3.bf16.msra.mxu0 %v1209_v37  ;;  %1739 = vmatprep.mubr.msk.bf16.mxu0 %vm2206_vm1, %v2205_v0 }
 0x44e   : > { %v1894_v38 = vpop.eup %1893 }
 0x44f   : > { %v1199_v39 = vmul.f32 %v1894_v38, %v1886_v17 }
 0x451   : > { %v1200_v40 = vpack.c.bf16 %v1199_v39, %v1199_v39 }
 0x453   : > { %1629 = vst.msk [vmem:[%s2645_s19 + $0xc] sm:$0xf] %vm863_vm4, %v1200_v40 }
 0x454   : > { %1740 = vmatmul.mubr.msk.bf16.vlgmr.msra.gmra.mrb[20].mxu0 %vm804_vm2, %v1200_v40 }
 0x4a4   : > { %v906_v41 = vpop.f32.mrb[8].mxu0 }
 0x4a5   : > { %v1705_v42 = vpop.f32.mrb[9].mxu0 }
 0x4a6   : > { %v909_v43 = vpop.f32.mrb[10].mxu0 }
 0x4a7   : > { %v1706_v44 = vpop.f32.mrb[11].mxu0 }
 0x516   : > { %v1021_v46 = vpop.f32.mrb[12].mxu0 }
 0x517   : > { %1252 = vrot.lane.b32.xlu1 %v1021_v46, %s2210_s12  ;;  %v1717_v47 = vpop.f32.mrb[13].mxu0 }
 0x518   : > { %v1024_v48 = vpop.f32.mrb[14].mxu0 }
 0x519   : > { %v1718_v49 = vpop.f32.mrb[15].mxu0 }
 0x51f   : > { %v1133_v51 = vpop.f32.mrb[16].mxu0 }
 0x520   : > { %1256 = vrot.lane.b32.xlu0 %v1133_v51, %s2211_s6  ;;  %v1729_v52 = vpop.f32.mrb[17].mxu0 }
 0x521   : > { %v1136_v53 = vpop.f32.mrb[18].mxu0 }
 0x522   : > { %v1730_v54 = vpop.f32.mrb[19].mxu0 }
 0x527   : > { %v1245_v55 = vpop.f32.mrb[20].mxu0 }
 0x528   : > { %1260 = vrot.lane.b32.xlu1 %v1245_v55, %s2212_s27  ;;  %v1741_v0 = vpop.f32.mrb[21].mxu0 }
 0x529   : > { %v1248_v56 = vpop.f32.mrb[22].mxu0 }
 0x52a   : > { %v1742_v57 = vpop.f32.mrb[23].mxu0 }
 0x589   : > { %v1253_v58 = vpop.permute.xlu1 %1252 }
 0x58a   : > { %v1263_v60 = vsel %vm804_vm2, %v906_v41, %v1253_v58 }
 0x592   : > { %v1257_v59 = vpop.permute.xlu0 %1256 }
 0x593   : > { %v1265_v61 = vsel %vm1264_vm5, %v1263_v60, %v1257_v59 }
 0x59a   : > { %v1261_v62 = vpop.permute.xlu1 %1260 }
 0x59b   : > { %v1267_v63 = vsel %vm1266_vm6, %v1265_v61, %v1261_v62 }
 0x59c   : > { %v1268_v1 = vpack.c.bf16 %v1267_v63, %v1267_v63 }
 0x59e   : > { %1748 = vmatmul.mubr.msk.bf16.vlgmr.msra.gmra.mrb[20].mxu1 %vm631_vm0, %v1268_v1 }
 0x59f   : > { %2082 = shalt.err (!%p2079_p12)
}
 0x5a0   : > { %s2083_s19 = scalar_lea.hbm %s2683_s24, 256  ;;  %s2087_s25 = scalar_lea.hbm %s2857_s10, 512 }
 0x5a1   : > { %p2084_p8 = scmp.ne.s32.totalorder %s2683_s24, %s2083_s19  ;;  %p2088_p5 = scmp.lt.u32.totalorder %s2683_s24, %s2857_s10 }
 0x5a2   : > { %p2089_p9 = scmp.lt.u32.totalorder %s2087_s25, %s2083_s19  ;;  %p2091_p4 = scmp.lt.u32.totalorder %s2083_s19, %s2683_s24 }
 0x5a3   : > { %p2085_p11 = pnand %p2084_p8, %p2858_p7 }
 0x5a4   : > { %p2090_p2 = por %p2089_p9, %p2088_p5 }
 0x5a5   : > { %p2086_p10 = pneg %p2085_p11 }
 0x5a6   : > { %p2092_p3 = por %p2091_p4, %p2090_p2 }
 0x5a8   : > { %p2093_p1 = pnand %p2092_p3, %p2086_p10 }
 0x5aa   : > { %2096 = shalt.err (!%p2093_p1)
}
 0x5ab   : > { %s2214_s30 = smov 64   ;;  %s2215_s6 = smov 4   ;;  %v1274_v2 = vld [vmem:[#allocation2] sm:$0xff] }
 0x5ac   : > { %1770 = dma.vmem_to_hbm [thread:$0]  (%p2858_p7), %s2685_s17, 256, %s2683_s24, %s1351_s14, %s2214_s30, %s2214_s30, %s2215_s6  }
 0x5ad   : > { %s1606_s27 = sshll.u32 %s2539_s3, 3  ;;  %s2859_s11 = sld [smem:[#allocation36_spill]] }
 0x5ae   : > { %s1637_s26 = sshll.u32 %s2855_s29, 7  ;;  %s573_s28 = scalar_lea.vmem [#allocation14], %s1606_s27 }
 0x5af   : > { %s1365_s15 = sshll.u32 %s573_s28, 4  ;;  %s2860_s14 = sld [smem:[#allocation37_spill]]  ;;  %s2722_s15 = int_to_ptr.vmem [resolvable:$true] %s1365_s15 }
 0x5b0   : > { %s1346_s19 = scalar_lea.sflag [#allocation5], %s2539_s3  ;;  %s2097_s1 = scalar_lea.vmem %s2722_s15, 128 }
 0x5b1   : > { %p2098_p13 = scmp.ne.s32.totalorder %s2722_s15, %s2097_s1  ;;  %s2216_s29 = smov [#allocation14]  }
 0x5b2   : > { %s2101_s9 = sshll.u32 %s2216_s29, 4  ;;  %s2102_s9 = int_to_ptr.vmem [resolvable:$false] %s2101_s9 }
 0x5b3   : > { %v1634_v8 = vld [vmem:[%s2859_s11] ss:$0 sm:$0xff]  ;;  %p2099_p6 = pnand %p2098_p13, %p2858_p7  ;;  %s2103_s25 = scalar_lea.vmem %s2102_s9, 256 }
 0x5b4   : > { %p2104_p12 = scmp.lt.s32.totalorder %s2722_s15, %s2102_s9  ;;  %p2105_p8 = scmp.lt.s32.totalorder %s2103_s25, %s2097_s1 }
 0x5b5   : > { %s2720_s21 = scalar_lea.hbm %s2860_s14, %s1637_s26  ;;  %p2100_p0 = pneg %p2099_p6 }
 0x5b6   : > { %p2106_p11 = por %p2105_p8, %p2104_p12 }
 0x5b8   : > { %p2107_p10 = pnand %p2106_p11, %p2100_p0 }
 0x671   : > { %v1324_v3 = vpop.f32.mrb[20].mxu1 }
 0x672   : > { %v1330_v4 = vadd.f32 %v1324_v3, %v1274_v2  ;;  %v1749_v5 = vpop.f32.mrb[21].mxu1 }
 0x673   : > { %v1327_v6 = vpop.f32.mrb[22].mxu1 }
 0x674   : > { %1331 = vst.msk [vmem:[#allocation2] sm:$0xff] %vm631_vm0, %v1330_v4  ;;  %v1750_v7 = vpop.f32.mrb[23].mxu1 }
 0x67b   : > { %v1335_v9 = vld [vmem:[#allocation2] sm:$0xff] }
 0x67c   : > { %v1343_v10 = vadd.f32 %v1634_v8, %v1335_v9 }
 0x67e   : > { %1344 = vst.msk [vmem:[%s573_s28] sm:$0xff] %vm631_vm0, %v1343_v10 }
 0x67f   : > { %2110 = shalt.err (!%p2107_p10)
}
 0x680   : > { %s2111_s3 = scalar_lea.hbm %s2720_s21, 128  ;;  %s2115_s30 = scalar_lea.hbm %s2860_s14, 256 }
 0x681   : > { %p2112_p5 = scmp.ne.s32.totalorder %s2720_s21, %s2111_s3  ;;  %p2116_p4 = scmp.lt.u32.totalorder %s2720_s21, %s2860_s14 }
 0x682   : > { %p2117_p3 = scmp.lt.u32.totalorder %s2115_s30, %s2111_s3  ;;  %p2119_p13 = scmp.lt.u32.totalorder %s2111_s3, %s2720_s21 }
 0x683   : > { %p2113_p9 = pnand %p2112_p5, %p2858_p7 }
 0x684   : > { %p2118_p1 = por %p2117_p3, %p2116_p4 }
 0x685   : > { %p2114_p2 = pneg %p2113_p9 }
 0x686   : > { %p2120_p6 = por %p2119_p13, %p2118_p1 }
 0x688   : > { %p2121_p0 = pnand %p2120_p6, %p2114_p2 }
 0x68a   : > { %2124 = shalt.err (!%p2121_p0)
}
 0x68b   : > { %1769 = dma.vmem_to_hbm [thread:$0]  (%p2858_p7), %s2722_s15, 128, %s2720_s21, %s1346_s19  }
 0x68c PF: > { %s2861_s16 = sld [smem:[#allocation23_spill]]  ;;  %s2862_s20 = sld [smem:[#allocation27_spill]] }
 0x68d   : > { %s2863_s11 = sld [smem:[#allocation26_spill]] }
 0x692   : > { %s1396_s26 = sand.u32 1, %s2861_s16   ;;  %p2864_p12 = scmp.ne.s32.totalorder %s2862_s20, 0 }
 0x693   : > { %p2865_p8 = scmp.ge.s32.totalorder %s2863_s11, 2  ;;  %s1397_s28 = scalar_lea.sflag [#allocation5], %s1396_s26 }
 0x695   : > { %p1794_p11 = pnand %p2865_p8, %p2864_p12 }
 0x697   : > { %2166 = dma.done.wait (!%p1794_p11), %s1397_s28, 128  }
 0x698   : > { %2168 = vsyncadd (!%p1794_p11), %s1397_s28, 4294967168  ;;  %s1406_s17 = scalar_lea.sflag [#allocation16], %s1396_s26 }
 0x699   : > { %2170 = dma.done.wait (!%p1794_p11), %s1406_s17, 256  }
 0x69a   : > { %2172 = vsyncadd (!%p1794_p11), %s1406_s17, 4294967040  ;;  %s37_s26 = sadd.s32 1, %s2863_s11   ;;  %s2866_s18 = sld [smem:[#allocation30_spill]] }
 0x69b   : > { %p34_p10 = scmp.ge.s32.totalorder %s37_s26, 4   ;;  %s2867_s24 = sld [smem:[#allocation25_spill]] }
 0x69c   : > { %s2868_s25 = sld [smem:[#allocation28_spill]]  ;;  %s2869_s21 = smov %s2179_s22 }
 0x69d   : > { %s2870_s22 = smov %s2183_s23  ;;  %36 = sbr.rel (!%p34_p10) target bundleno = 21 (0x15), region = 180 }
 0x6a0   : > { %s2871_s23 = smov %s2866_s18 }
 0x6a4   :  { %1411 = vsyncpa [#allocation4], 1 }
 0x6a5   :  { %1413 = vsyncpa [#allocation4 + $0x1], 1 }
 0x6a6   :  { %1414 = vsyncpa [#allocation7], 1 }
 0x6a7   :  { %1416 = vsyncpa [#allocation7 + $0x1], 1 }
 0x6a8   :  { %1417 = vsyncpa [#allocation10], 1 }
 0x6a9   :  { %1418 = vsyncpa [#allocation13], 1 }
 0x6aa   :  { %1419 = vsyncpa [#allocation5], 1 }
 0x6ab   :  { %1421 = vsyncpa [#allocation5 + $0x1], 1 }
 0x6ac   :  { %1422 = vsyncpa [#allocation16], 1 }
 0x6ad   :  { %1424 = vsyncpa [#allocation16 + $0x1], 1 }

</bundles_post_ra>
